<compile_context>
chip_gen: v7x
topology: tpu7x:2x2x1
jax: 0.10.0
libtpu: 0.0.40
codegen_flags: <defaults>
</compile_context>

<pallas_src>
import jax
import jax.numpy as jnp
from jax.experimental import pallas as pl
from jax.experimental.pallas import tpu as pltpu

BN_EPS = 1e-5
LANE = 128  # lane width; output slab is padded to this many columns


# ---------------------------------------------------------------------------
# Kernel
# ---------------------------------------------------------------------------
def microbiome_kernel(
    x_ref,
    w1_ref,                    # fused [wa1 | wb1 | wc1]  (F, 3H) bf16
    ba1_ref, wa2_ref, ba2_ref,  # attention head biases / (1,H) reduce vector
    bb1_ref, bc1_ref,           # branch first-layer biases
    w2_ref, b2_ref,             # blockdiag(wb2', wc2') (2H,2H) bf16, [bb2'|bc2']
    wf1_ref, bf1_ref,           # final Linear(2H,H) bf16, bias
    wf2_ref, bf2_ref,           # final Linear(H,128-padded) bf16 (BN folded)
    out_ref,
):
    H = ba1_ref.shape[-1]
    xb = x_ref[...].astype(jnp.bfloat16)                       # (TB, F)

    # ---- fused first layer: one (TB,F)x(F,3H) matmul, slice at 0/H/2H ----
    p = jnp.dot(xb, w1_ref[...], preferred_element_type=jnp.float32)  # (TB,3H)

    # feature attention: ReLU -> lane-reduction (H,1 matmul on VPU/XLU) -> sigmoid
    h_att = jnp.maximum(p[:, :H] + ba1_ref[...], 0.0)
    att_logit = jnp.sum(h_att * wa2_ref[...], axis=-1, keepdims=True) + ba2_ref[...]
    attention = jax.nn.sigmoid(att_logit)                      # (TB, 1) f32

    # branch first layers; attention commuted past the matmul for abundance
    hb = jnp.maximum(attention * p[:, H:2 * H] + bb1_ref[...], 0.0)   # (TB,H)
    hc = jnp.maximum(p[:, 2 * H:] + bc1_ref[...], 0.0)                # (TB,H)
    h = jnp.concatenate([hb, hc], axis=-1).astype(jnp.bfloat16)       # (TB,2H)

    # ---- block-diagonal second layer -> [abundance | interaction] ----
    combined = jnp.dot(h, w2_ref[...], preferred_element_type=jnp.float32) + b2_ref[...]

    # ---- final layers: Linear(2H,H) -> ReLU -> [BN folded] -> Linear(H,128pad) ----
    f = (jnp.dot(combined.astype(jnp.bfloat16), wf1_ref[...],
                 preferred_element_type=jnp.float32) + bf1_ref[...])
    f = jnp.maximum(f, 0.0).astype(jnp.bfloat16)
    out = jnp.dot(f, wf2_ref[...], preferred_element_type=jnp.float32) + bf2_ref[...]
    out_ref[...] = out.astype(out_ref.dtype)                   # lane-dense (TB,128)


# ---------------------------------------------------------------------------
# Wrapper
# ---------------------------------------------------------------------------
def _round_up(n, m):
    return (n + m - 1) // m * m


def microbiome_net(x, kernel_params, *, out_dim, block_b=512):
    """x: (B, F) float32 or bfloat16.  kernel_params: list from prepare_params()."""
    B, F = x.shape
    H = kernel_params[1].shape[-1]

    # Batch tile: as large as block_b allows, sublane-aligned, but keep the
    # grid >= 2 tiles when possible so v7x's two TensorCores both get work.
    B_pad8 = _round_up(B, 8)
    TB = min(block_b, B_pad8)
    if TB == B_pad8 and B_pad8 >= 16:
        TB = _round_up(B_pad8 // 2, 8)
    B_pad = _round_up(B, TB)
    if B_pad != B:
        x = jnp.pad(x, ((0, B_pad - B), (0, 0)))
    grid = (B_pad // TB,)

    def const_spec(p):
        zero = (0,) * p.ndim
        return pl.BlockSpec(p.shape, lambda i, _z=zero: _z)   # weights stay resident

    in_specs = [pl.BlockSpec((TB, F), lambda i: (i, 0))]
    in_specs += [const_spec(p) for p in kernel_params]
    out_spec = pl.BlockSpec((TB, LANE), lambda i: (i, 0))

    # Advisory cost estimate (lets XLA schedule surrounding ops sensibly).
    weight_bytes = sum(int(p.size) * p.dtype.itemsize for p in kernel_params)
    flops = 2 * B_pad * (F * 3 * H + (2 * H) * (2 * H) + (2 * H) * H + H * LANE)
    cost = pl.CostEstimate(
        flops=flops,
        transcendentals=B_pad,  # one sigmoid per row
        bytes_accessed=B_pad * F * x.dtype.itemsize + B_pad * LANE * 4 + weight_bytes,
    )

    # NOTE: at these sizes (~0.6 MiB resident weights + a double-buffered x
    # tile) the default scoped VMEM is ample on v5e/v6e/v7x; revisit
    # vmem_limit_bytes only if F or block_b grow by ~an order of magnitude.
    out = pl.pallas_call(
        microbiome_kernel,
        out_shape=jax.ShapeDtypeStruct((B_pad, LANE), jnp.float32),
        grid=grid,
        in_specs=in_specs,
        out_specs=out_spec,
        compiler_params=pltpu.CompilerParams(
            dimension_semantics=("parallel",)),
        cost_estimate=cost,
    )(x, *kernel_params)
    return out[:B, :out_dim]


# ---------------------------------------------------------------------------
# Parameter construction / preparation
# ---------------------------------------------------------------------------
def init_params(key, input_size, hidden_size, output_size):
    """Deterministic synthetic parameters in PyTorch-like layout (transposed W)."""
    ks = jax.random.split(key, 16)
    s = 0.02

    def lin(k, fan_in, fan_out):
        kw, kb = jax.random.split(k)
        w = jax.random.normal(kw, (fan_in, fan_out), jnp.float32) * s
        b = jax.random.normal(kb, (1, fan_out), jnp.float32) * s
        return w, b

    def bn(k, h):
        k1, k2, k3, k4 = jax.random.split(k, 4)
        gamma = 1.0 + 0.3 * jax.random.normal(k1, (1, h), jnp.float32)
        beta = 0.1 * jax.random.normal(k2, (1, h), jnp.float32)
        mean = 0.1 * jax.random.normal(k3, (1, h), jnp.float32)
        var = jax.random.uniform(k4, (1, h), jnp.float32, 0.5, 1.5)
        return gamma, beta, mean, var

    F, H, O = input_size, hidden_size, output_size

    wa1, ba1 = lin(ks[0], F, H)
    wa2, ba2 = lin(ks[1], H, 1)

    wb1, bb1 = lin(ks[2], F, H)
    gb, betab, mb, vb = bn(ks[8], H)
    wb2, bb2 = lin(ks[3], H, H)

    wc1, bc1 = lin(ks[4], F, H)
    gc, betac, mc, vc = bn(ks[9], H)
    wc2, bc2 = lin(ks[5], H, H)

    wf1, bf1 = lin(ks[6], 2 * H, H)
    gf, betaf, mf, vf = bn(ks[10], H)
    wf2, bf2 = lin(ks[7], H, O)

    return [
        wa1, ba1, wa2, ba2,
        wb1, bb1, gb, betab, mb, vb, wb2, bb2,
        wc1, bc1, gc, betac, mc, vc, wc2, bc2,
        wf1, bf1, gf, betaf, mf, vf, wf2, bf2,
    ]


def prepare_params(raw, output_size):
    """Fold eval-mode BN into following Linears, fuse first-layer weights into
    (F,3H), build the block-diagonal branch-2 weight, pad wf2 to 128 lanes and
    cast matmul weights to bf16 (biases / attention vector stay f32)."""
    (wa1, ba1, wa2, ba2,
     wb1, bb1, gb, betab, mb, vb, wb2, bb2,
     wc1, bc1, gc, betac, mc, vc, wc2, bc2,
     wf1, bf1, gf, betaf, mf, vf, wf2, bf2) = raw

    def fold(gamma, beta, mean, var, w2, b2):
        scale = gamma * jax.lax.rsqrt(var + BN_EPS)        # (1, H)
        shift = beta - mean * scale                        # (1, H)
        w2f = w2 * scale.reshape(-1, 1)                    # scale rows of w2
        b2f = b2 + shift @ w2
        return w2f, b2f

    wb2f, bb2f = fold(gb, betab, mb, vb, wb2, bb2)
    wc2f, bc2f = fold(gc, betac, mc, vc, wc2, bc2)
    wf2f, bf2f = fold(gf, betaf, mf, vf, wf2, bf2)

    H = wa1.shape[1]
    O = output_size

    # Fused first layer: one (F, 3H) weight feeding attention / abundance / interaction.
    w1 = jnp.concatenate([wa1, wb1, wc1], axis=1)

    # Block-diagonal branch-2 weight: [hb|hc] @ blockdiag(wb2', wc2') = [ab|it].
    w2 = jnp.zeros((2 * H, 2 * H), jnp.float32)
    w2 = w2.at[:H, :H].set(wb2f).at[H:, H:].set(wc2f)
    b2 = jnp.concatenate([bb2f, bc2f], axis=1)

    # Lane-dense output head.
    wf2p = jnp.zeros((H, LANE), jnp.float32).at[:, :O].set(wf2f)
    bf2p = jnp.zeros((1, LANE), jnp.float32).at[:, :O].set(bf2f)

    bf16 = lambda w: w.astype(jnp.bfloat16)
    return [
        bf16(w1),
        ba1, wa2.reshape(1, -1), ba2.reshape(1, 1),
        bb1, bc1,
        bf16(w2), b2,
        bf16(wf1), bf1,
        bf16(wf2p), bf2p,
    ]


# ---------------------------------------------------------------------------
# Pure-JAX f32 reference (PyTorch eval-mode semantics)
# ---------------------------------------------------------------------------
def reference(x, p):
    (wa1, ba1, wa2, ba2,
     wb1, bb1, gb, betab, mb, vb, wb2, bb2,
     wc1, bc1, gc, betac, mc, vc, wc2, bc2,
     wf1, bf1, gf, betaf, mf, vf, wf2, bf2) = p
    att = jax.nn.sigmoid(jnp.maximum(x @ wa1 + ba1, 0.0) @ wa2 + ba2)
    xa = x * att

    def br(inp, w1, b1, g, be, m, v, w2, b2):
        h = jnp.maximum(inp @ w1 + b1, 0.0)
        h = (h - m) * jax.lax.rsqrt(v + BN_EPS) * g + be
        return h @ w2 + b2

    ab = br(xa, wb1, bb1, gb, betab, mb, vb, wb2, bb2)
    it = br(x, wc1, bc1, gc, betac, mc, vc, wc2, bc2)
    c = jnp.concatenate([ab, it], axis=1)
    f = jnp.maximum(c @ wf1 + bf1, 0.0)
    f = (f - mf) * jax.lax.rsqrt(vf + BN_EPS) * gf + betaf
    return f @ wf2 + bf2


# ---------------------------------------------------------------------------
if __name__ == "__main__":
    # Small shapes consistent with the module (input_size, hidden_size, output_size),
    # with enough batch to exercise a 2-tile grid (both v7x TensorCores busy).
    B, F, H, O = 256, 512, 128, 2

    key = jax.random.PRNGKey(0)
    kx, kp = jax.random.split(key)
    x = jax.random.normal(kx, (B, F), jnp.float32)
    raw_params = init_params(kp, F, H, O)
    kernel_params = prepare_params(raw_params, O)

    out = microbiome_net(x, kernel_params, out_dim=O)
    out = jax.block_until_ready(out)

    ref = reference(x, raw_params)
    assert out.shape == (B, O)
    err = float(jnp.max(jnp.abs(out - ref)))
    tol = 3e-2 * float(jnp.max(jnp.abs(ref))) + 1e-3   # bf16-weight tolerance
    assert err <= tol, f"mismatch: max abs err {err} > tol {tol}"
    print("KERNEL_OK")
</pallas_src>

<mosaic_0001>
module attributes {stable_mosaic.version = 11 : i64} {
  func.func @microbiome_kernel(%arg0: i32, %arg1: memref<128x512xf32, #tpu.memory_space<vmem>>, %arg2: memref<512x384xbf16, #tpu.memory_space<vmem>>, %arg3: memref<1x128xf32, #tpu.memory_space<vmem>>, %arg4: memref<1x128xf32, #tpu.memory_space<vmem>>, %arg5: memref<1x1xf32, #tpu.memory_space<vmem>>, %arg6: memref<1x128xf32, #tpu.memory_space<vmem>>, %arg7: memref<1x128xf32, #tpu.memory_space<vmem>>, %arg8: memref<256x256xbf16, #tpu.memory_space<vmem>>, %arg9: memref<1x256xf32, #tpu.memory_space<vmem>>, %arg10: memref<256x128xbf16, #tpu.memory_space<vmem>>, %arg11: memref<1x128xf32, #tpu.memory_space<vmem>>, %arg12: memref<128x128xbf16, #tpu.memory_space<vmem>>, %arg13: memref<1x128xf32, #tpu.memory_space<vmem>>, %arg14: memref<128x128xf32, #tpu.memory_space<vmem>>) attributes {dimension_semantics = [#tpu.dimension_semantics<parallel>], iteration_bounds = array<i64: 2>, scalar_prefetch = 0 : i64, scratch_operands = 0 : i64, tpu.core_type = #tpu.core_type<tc>, window_params = [{transform_indices = @transform_0, window_bounds = array<i64: 128, 512>}, {pipeline_mode = #tpu.pipeline_mode<synchronous>, transform_indices = @transform_1, window_bounds = array<i64: 512, 384>}, {pipeline_mode = #tpu.pipeline_mode<synchronous>, transform_indices = @transform_2, window_bounds = array<i64: 1, 128>}, {pipeline_mode = #tpu.pipeline_mode<synchronous>, transform_indices = @transform_3, window_bounds = array<i64: 1, 128>}, {pipeline_mode = #tpu.pipeline_mode<synchronous>, transform_indices = @transform_4, window_bounds = array<i64: 1, 1>}, {pipeline_mode = #tpu.pipeline_mode<synchronous>, transform_indices = @transform_5, window_bounds = array<i64: 1, 128>}, {pipeline_mode = #tpu.pipeline_mode<synchronous>, transform_indices = @transform_6, window_bounds = array<i64: 1, 128>}, {pipeline_mode = #tpu.pipeline_mode<synchronous>, transform_indices = @transform_7, window_bounds = array<i64: 256, 256>}, {pipeline_mode = #tpu.pipeline_mode<synchronous>, transform_indices = @transform_8, window_bounds = array<i64: 1, 256>}, {pipeline_mode = #tpu.pipeline_mode<synchronous>, transform_indices = @transform_9, window_bounds = array<i64: 256, 128>}, {pipeline_mode = #tpu.pipeline_mode<synchronous>, transform_indices = @transform_10, window_bounds = array<i64: 1, 128>}, {pipeline_mode = #tpu.pipeline_mode<synchronous>, transform_indices = @transform_11, window_bounds = array<i64: 128, 128>}, {pipeline_mode = #tpu.pipeline_mode<synchronous>, transform_indices = @transform_12, window_bounds = array<i64: 1, 128>}, {transform_indices = @transform_13, window_bounds = array<i64: 128, 128>}]} {
    %c0 = arith.constant 0 : index
    %c0_0 = arith.constant 0 : index
    %0 = vector.load %arg1[%c0, %c0_0] : memref<128x512xf32, #tpu.memory_space<vmem>>, vector<128x512xf32>
    %1 = arith.truncf %0 : vector<128x512xf32> to vector<128x512xbf16>
    %c0_1 = arith.constant 0 : index
    %c0_2 = arith.constant 0 : index
    %2 = vector.load %arg2[%c0_1, %c0_2] : memref<512x384xbf16, #tpu.memory_space<vmem>>, vector<512x384xbf16>
    %cst = arith.constant dense<0.000000e+00> : vector<128x384xf32>
    %3 = tpu.matmul %1, %2, %cst {dimension_numbers = #tpu.dot_dimension_numbers<[1], [0], [0], [1], [0, 0, 1, 1], [], []>} : vector<128x512xbf16>, vector<512x384xbf16>, vector<128x384xf32> -> vector<128x384xf32>
    %4 = vector.extract_strided_slice %3 {offsets = [0, 0], sizes = [128, 128], strides = [1, 1]} : vector<128x384xf32> to vector<128x128xf32>
    %c0_3 = arith.constant 0 : index
    %c0_4 = arith.constant 0 : index
    %5 = vector.load %arg3[%c0_3, %c0_4] : memref<1x128xf32, #tpu.memory_space<vmem>>, vector<1x128xf32>
    %6 = vector.broadcast %5 : vector<1x128xf32> to vector<128x128xf32>
    %7 = arith.addf %4, %6 : vector<128x128xf32>
    %cst_5 = arith.constant 0.000000e+00 : f32
    %8 = vector.broadcast %cst_5 : f32 to vector<128x128xf32>
    %9 = arith.maximumf %7, %8 : vector<128x128xf32>
    %c0_6 = arith.constant 0 : index
    %c0_7 = arith.constant 0 : index
    %10 = vector.load %arg4[%c0_6, %c0_7] : memref<1x128xf32, #tpu.memory_space<vmem>>, vector<1x128xf32>
    %11 = vector.broadcast %10 : vector<1x128xf32> to vector<128x128xf32>
    %12 = arith.mulf %9, %11 : vector<128x128xf32>
    %cst_8 = arith.constant dense<0.000000e+00> : vector<128xf32>
    %13 = vector.multi_reduction <add>, %12, %cst_8 [1] : vector<128x128xf32> to vector<128xf32>
    %14 = vector.shape_cast %13 : vector<128xf32> to vector<128x1xf32>
    %c0_9 = arith.constant 0 : index
    %c0_10 = arith.constant 0 : index
    %15 = vector.load %arg5[%c0_9, %c0_10] : memref<1x1xf32, #tpu.memory_space<vmem>>, vector<1x1xf32>
    %16 = vector.broadcast %15 : vector<1x1xf32> to vector<128x1xf32>
    %17 = arith.addf %14, %16 : vector<128x1xf32>
    %18 = arith.negf %17 : vector<128x1xf32>
    %19 = math.exp %18 : vector<128x1xf32>
    %cst_11 = arith.constant 1.000000e+00 : f32
    %20 = vector.broadcast %cst_11 : f32 to vector<128x1xf32>
    %21 = arith.addf %20, %19 : vector<128x1xf32>
    %22 = arith.divf %20, %21 : vector<128x1xf32>
    %23 = vector.extract_strided_slice %3 {offsets = [0, 128], sizes = [128, 128], strides = [1, 1]} : vector<128x384xf32> to vector<128x128xf32>
    %24 = vector.broadcast %22 : vector<128x1xf32> to vector<128x128xf32>
    %25 = arith.mulf %24, %23 : vector<128x128xf32>
    %c0_12 = arith.constant 0 : index
    %c0_13 = arith.constant 0 : index
    %26 = vector.load %arg6[%c0_12, %c0_13] : memref<1x128xf32, #tpu.memory_space<vmem>>, vector<1x128xf32>
    %27 = vector.broadcast %26 : vector<1x128xf32> to vector<128x128xf32>
    %28 = arith.addf %25, %27 : vector<128x128xf32>
    %cst_14 = arith.constant 0.000000e+00 : f32
    %29 = vector.broadcast %cst_14 : f32 to vector<128x128xf32>
    %30 = arith.maximumf %28, %29 : vector<128x128xf32>
    %31 = vector.extract_strided_slice %3 {offsets = [0, 256], sizes = [128, 128], strides = [1, 1]} : vector<128x384xf32> to vector<128x128xf32>
    %c0_15 = arith.constant 0 : index
    %c0_16 = arith.constant 0 : index
    %32 = vector.load %arg7[%c0_15, %c0_16] : memref<1x128xf32, #tpu.memory_space<vmem>>, vector<1x128xf32>
    %33 = vector.broadcast %32 : vector<1x128xf32> to vector<128x128xf32>
    %34 = arith.addf %31, %33 : vector<128x128xf32>
    %cst_17 = arith.constant 0.000000e+00 : f32
    %35 = vector.broadcast %cst_17 : f32 to vector<128x128xf32>
    %36 = arith.maximumf %34, %35 : vector<128x128xf32>
    %37 = tpu.concatenate %30, %36 in 1 : vector<128x128xf32>, vector<128x128xf32> -> vector<128x256xf32>
    %38 = arith.truncf %37 : vector<128x256xf32> to vector<128x256xbf16>
    %c0_18 = arith.constant 0 : index
    %c0_19 = arith.constant 0 : index
    %39 = vector.load %arg8[%c0_18, %c0_19] : memref<256x256xbf16, #tpu.memory_space<vmem>>, vector<256x256xbf16>
    %cst_20 = arith.constant dense<0.000000e+00> : vector<128x256xf32>
    %40 = tpu.matmul %38, %39, %cst_20 {dimension_numbers = #tpu.dot_dimension_numbers<[1], [0], [0], [1], [0, 0, 1, 1], [], []>} : vector<128x256xbf16>, vector<256x256xbf16>, vector<128x256xf32> -> vector<128x256xf32>
    %c0_21 = arith.constant 0 : index
    %c0_22 = arith.constant 0 : index
    %41 = vector.load %arg9[%c0_21, %c0_22] : memref<1x256xf32, #tpu.memory_space<vmem>>, vector<1x256xf32>
    %42 = vector.broadcast %41 : vector<1x256xf32> to vector<128x256xf32>
    %43 = arith.addf %40, %42 : vector<128x256xf32>
    %44 = arith.truncf %43 : vector<128x256xf32> to vector<128x256xbf16>
    %c0_23 = arith.constant 0 : index
    %c0_24 = arith.constant 0 : index
    %45 = vector.load %arg10[%c0_23, %c0_24] : memref<256x128xbf16, #tpu.memory_space<vmem>>, vector<256x128xbf16>
    %cst_25 = arith.constant dense<0.000000e+00> : vector<128x128xf32>
    %46 = tpu.matmul %44, %45, %cst_25 {dimension_numbers = #tpu.dot_dimension_numbers<[1], [0], [0], [1], [0, 0, 1, 1], [], []>} : vector<128x256xbf16>, vector<256x128xbf16>, vector<128x128xf32> -> vector<128x128xf32>
    %c0_26 = arith.constant 0 : index
    %c0_27 = arith.constant 0 : index
    %47 = vector.load %arg11[%c0_26, %c0_27] : memref<1x128xf32, #tpu.memory_space<vmem>>, vector<1x128xf32>
    %48 = vector.broadcast %47 : vector<1x128xf32> to vector<128x128xf32>
    %49 = arith.addf %46, %48 : vector<128x128xf32>
    %cst_28 = arith.constant 0.000000e+00 : f32
    %50 = vector.broadcast %cst_28 : f32 to vector<128x128xf32>
    %51 = arith.maximumf %49, %50 : vector<128x128xf32>
    %52 = arith.truncf %51 : vector<128x128xf32> to vector<128x128xbf16>
    %c0_29 = arith.constant 0 : index
    %c0_30 = arith.constant 0 : index
    %53 = vector.load %arg12[%c0_29, %c0_30] : memref<128x128xbf16, #tpu.memory_space<vmem>>, vector<128x128xbf16>
    %cst_31 = arith.constant dense<0.000000e+00> : vector<128x128xf32>
    %54 = tpu.matmul %52, %53, %cst_31 {dimension_numbers = #tpu.dot_dimension_numbers<[1], [0], [0], [1], [0, 0, 1, 1], [], []>} : vector<128x128xbf16>, vector<128x128xbf16>, vector<128x128xf32> -> vector<128x128xf32>
    %c0_32 = arith.constant 0 : index
    %c0_33 = arith.constant 0 : index
    %55 = vector.load %arg13[%c0_32, %c0_33] : memref<1x128xf32, #tpu.memory_space<vmem>>, vector<1x128xf32>
    %56 = vector.broadcast %55 : vector<1x128xf32> to vector<128x128xf32>
    %57 = arith.addf %54, %56 : vector<128x128xf32>
    %c0_34 = arith.constant 0 : index
    %c0_35 = arith.constant 0 : index
    %58 = vector.load %arg14[%c0_34, %c0_35] : memref<128x128xf32, #tpu.memory_space<vmem>>, vector<128x128xf32>
    tpu.vector_store %arg14[%c0_34, %c0_35], %57 {strides = array<i32>} : memref<128x128xf32, #tpu.memory_space<vmem>>, vector<128x128xf32>,
    return
  }
  func.func @transform_0(%arg0: i32) -> (i32, i32) {
    %c0_i32 = arith.constant 0 : i32
    %c0_i32_0 = arith.constant 0 : i32
    return %arg0, %c0_i32 : i32, i32
  }
  func.func @transform_1(%arg0: i32) -> (i32, i32) {
    %c0_i32 = arith.constant 0 : i32
    %c0_i32_0 = arith.constant 0 : i32
    %c0_i32_1 = arith.constant 0 : i32
    return %c0_i32, %c0_i32_0 : i32, i32
  }
  func.func @transform_2(%arg0: i32) -> (i32, i32) {
    %c0_i32 = arith.constant 0 : i32
    %c0_i32_0 = arith.constant 0 : i32
    %c0_i32_1 = arith.constant 0 : i32
    return %c0_i32, %c0_i32_0 : i32, i32
  }
  func.func @transform_3(%arg0: i32) -> (i32, i32) {
    %c0_i32 = arith.constant 0 : i32
    %c0_i32_0 = arith.constant 0 : i32
    %c0_i32_1 = arith.constant 0 : i32
    return %c0_i32, %c0_i32_0 : i32, i32
  }
  func.func @transform_4(%arg0: i32) -> (i32, i32) {
    %c0_i32 = arith.constant 0 : i32
    %c0_i32_0 = arith.constant 0 : i32
    %c0_i32_1 = arith.constant 0 : i32
    return %c0_i32, %c0_i32_0 : i32, i32
  }
  func.func @transform_5(%arg0: i32) -> (i32, i32) {
    %c0_i32 = arith.constant 0 : i32
    %c0_i32_0 = arith.constant 0 : i32
    %c0_i32_1 = arith.constant 0 : i32
    return %c0_i32, %c0_i32_0 : i32, i32
  }
  func.func @transform_6(%arg0: i32) -> (i32, i32) {
    %c0_i32 = arith.constant 0 : i32
    %c0_i32_0 = arith.constant 0 : i32
    %c0_i32_1 = arith.constant 0 : i32
    return %c0_i32, %c0_i32_0 : i32, i32
  }
  func.func @transform_7(%arg0: i32) -> (i32, i32) {
    %c0_i32 = arith.constant 0 : i32
    %c0_i32_0 = arith.constant 0 : i32
    %c0_i32_1 = arith.constant 0 : i32
    return %c0_i32, %c0_i32_0 : i32, i32
  }
  func.func @transform_8(%arg0: i32) -> (i32, i32) {
    %c0_i32 = arith.constant 0 : i32
    %c0_i32_0 = arith.constant 0 : i32
    %c0_i32_1 = arith.constant 0 : i32
    return %c0_i32, %c0_i32_0 : i32, i32
  }
  func.func @transform_9(%arg0: i32) -> (i32, i32) {
    %c0_i32 = arith.constant 0 : i32
    %c0_i32_0 = arith.constant 0 : i32
    %c0_i32_1 = arith.constant 0 : i32
    return %c0_i32, %c0_i32_0 : i32, i32
  }
  func.func @transform_10(%arg0: i32) -> (i32, i32) {
    %c0_i32 = arith.constant 0 : i32
    %c0_i32_0 = arith.constant 0 : i32
    %c0_i32_1 = arith.constant 0 : i32
    return %c0_i32, %c0_i32_0 : i32, i32
  }
  func.func @transform_11(%arg0: i32) -> (i32, i32) {
    %c0_i32 = arith.constant 0 : i32
    %c0_i32_0 = arith.constant 0 : i32
    %c0_i32_1 = arith.constant 0 : i32
    return %c0_i32, %c0_i32_0 : i32, i32
  }
  func.func @transform_12(%arg0: i32) -> (i32, i32) {
    %c0_i32 = arith.constant 0 : i32
    %c0_i32_0 = arith.constant 0 : i32
    %c0_i32_1 = arith.constant 0 : i32
    return %c0_i32, %c0_i32_0 : i32, i32
  }
  func.func @transform_13(%arg0: i32) -> (i32, i32) {
    %c0_i32 = arith.constant 0 : i32
    %c0_i32_0 = arith.constant 0 : i32
    return %arg0, %c0_i32 : i32, i32
  }
}

</mosaic_0001>

<bundles_post_ra>
// kernel: tpu_custom_call.1
= control target key start
LH: loop header
LB: loop body
LE: loop exit
PB: predicated region body
PF: predicated region fallthrough
CT: control target
= control target key end

     0   :  { %s4841_s0 = inlined_call_operand.hbm [shape: f32[256,512], index: 0, kind: input, shape index: {}]   ;;  %s4842_s1 = inlined_call_operand.hbm [shape: bf16[512,384], index: 1, kind: input, shape index: {}]   ;;  %s4843_s2 = inlined_call_operand.vmem [shape: f32[1,128], index: 2, kind: input, shape index: {}]   ;;  %s4844_s3 = inlined_call_operand.vmem [shape: f32[1,128], index: 3, kind: input, shape index: {}]   ;;  %s4845_s4 = inlined_call_operand.<no memory space> [shape: f32[1,1], index: 4, kind: input, shape index: {}]   ;;  %s4846_s5 = inlined_call_operand.vmem [shape: f32[1,128], index: 5, kind: input, shape index: {}]   ;;  %s4847_s6 = inlined_call_operand.vmem [shape: f32[1,128], index: 6, kind: input, shape index: {}]   ;;  %s4848_s7 = inlined_call_operand.hbm [shape: bf16[256,256], index: 7, kind: input, shape index: {}]   ;;  %s4849_s8 = inlined_call_operand.vmem [shape: f32[1,256], index: 8, kind: input, shape index: {}]   ;;  %s4850_s9 = inlined_call_operand.hbm [shape: bf16[256,128], index: 9, kind: input, shape index: {}]   ;;  %s4851_s10 = inlined_call_operand.vmem [shape: f32[1,128], index: 10, kind: input, shape index: {}]   ;;  %s4852_s11 = inlined_call_operand.hbm [shape: bf16[128,128], index: 11, kind: input, shape index: {}]   ;;  %s4853_s12 = inlined_call_operand.vmem [shape: f32[1,128], index: 12, kind: input, shape index: {}]   ;;  %s4854_s13 = inlined_call_operand.hbm [shape: f32[256,128], index: 13, kind: output, shape index: {}]  }
   0x1   :  { %4863 = sst [smem:[#allocation19_spill]] %s4842_s1  ;;  %v18_v0 = vstv %s4845_s4 }
   0x2   :  { %4864 = sst [smem:[#allocation20_spill]] %s4851_s10  ;;  %19 = vst [vmem:[#allocation2] sm:$0x1] %v18_v0 }
   0x3   :  { %4865 = sst [smem:[#allocation21_spill]] %s4853_s12 }
   0x4   :  { %4866 = sst [smem:[#allocation22_spill]] %s4854_s13 }
   0x5   :  { %20 = vsyncpa [#allocation4], 0 }
   0x6   :  { %22 = vsyncpa [#allocation4 + $0x1], 0 }
   0x7   :  { %23 = vsyncpa [#allocation7], 0 }
   0x8   :  { %24 = vsyncpa [#allocation10], 0 }
   0x9   :  { %25 = vsyncpa [#allocation5], 0 }
   0xa   :  { %27 = vsyncpa [#allocation5 + $0x1], 0  ;;  %s4125_s27 = smov 0   ;;  %s4127_s28 = smov 0  }
   0xb   :  { %s4129_s29 = smov 0   ;;  %s4131_s30 = smov 0  }
   0xc LB: > { %4867 = sst [smem:[#allocation17_spill]] %s4021_s27  ;;  %s4146_s4 = sadd.s32 4294967295, %s4033_s30   ;;  %s4033_s30 = sphi %s4131_s30, %s4896_s30   ;;  %s4029_s29 = sphi %s4129_s29, %s4895_s29   ;;  %s4025_s28 = sphi %s4127_s28, %s4894_s28   ;;  %s4021_s27 = sphi %s4125_s27, %s4893_s27  }
   0xd   : > { %s2980_s14 = sadd.s32 4294967294, %s4033_s30   ;;  %p53_p0 = scmp.ne.s32.totalorder %s4025_s28, %s4021_s27 }
   0xe   : > { %p4856_p1 = scmp.eq.s32.totalorder %s4146_s4, 0  ;;  %p335_p3 = scmp.eq.s32.totalorder %s2980_s14, 1 }
   0xf   : > { %p2981_p5 = scmp.ge.s32.totalorder %s4033_s30, 1  ;;  %p342_p7 = scmp.lt.s32.totalorder %s4033_s30, 3 }
  0x10   : > { %p4155_p4 = por %p4856_p1, %p53_p0  ;;  %p4160_p6 = por %p335_p3, %p53_p0 }
  0x11   : > { %p4165_p8 = pnand %p2981_p5, %p342_p7  ;;  %s4035_s18 = smov [#allocation6]  }
  0x12   : > { %s4868_s15 = scalar_select %p4155_p4, 1, 0 }
  0x13   : > { %s4869_s16 = scalar_select %p4160_p6, 1, 0 }
  0x14   : > { %s4871_s17 = scalar_select %p4165_p8, 1, 0 }
  0x15   : > { %4870 = sst [smem:[#allocation18_spill]] %s4869_s16  ;;  %s354_s19 = sshll.u32 %s4035_s18, 4  ;;  %s4169_s19 = int_to_ptr.vmem [resolvable:$true] %s354_s19 }
  0x16   : > { %p3473_p9 = pneg %p4165_p8  ;;  %s4036_s21 = smov [#allocation9]  }
  0x17   : > { %s398_s22 = sshll.u32 %s4036_s21, 4  ;;  %s4873_s1 = sld [smem:[#allocation19_spill]]  ;;  %s4180_s22 = int_to_ptr.vmem [resolvable:$true] %s398_s22 }
  0x18   : > { %p4176_p11 = pnand %p3473_p9, %p4856_p1 }
  0x1a   : > { %p4190_p13 = pneg %p4176_p11 }
  0x1d   : > { %s3817_s25 = scalar_lea.hbm %s4873_s1, 12288 }
  0x1e   : > { %p3818_p12 = scmp.ne.s32.totalorder %s4873_s1, %s3817_s25  ;;  %p3824_p5 = scmp.lt.u32.totalorder %s3817_s25, %s4873_s1 }
  0x20   : > { %p3820_p0 = pnand %p4190_p13, %p3818_p12 }
  0x22   : > { %p3821_p3 = pneg %p3820_p0 }
  0x24   : > { %p3826_p7 = pnand %p3824_p5, %p3821_p3 }
  0x26   : > { %3829 = shalt.err (!%p3826_p7)
}
  0x27   : > { %s3830_s23 = scalar_lea.vmem %s4169_s19, 12288  ;;  %p3838_p2 = scmp.lt.s32.totalorder %s4169_s19, %s4169_s19 }
  0x28   : > { %p3831_p9 = scmp.ne.s32.totalorder %s4169_s19, %s3830_s23  ;;  %p3839_p6 = scmp.lt.s32.totalorder %s3830_s23, %s3830_s23 }
  0x2a   : > { %p3833_p10 = pnand %p3831_p9, %p4190_p13  ;;  %p3840_p12 = por %p3839_p6, %p3838_p2 }
  0x2c   : > { %p3834_p1 = pneg %p3833_p10 }
  0x2e   : > { %p3841_p0 = pnand %p3840_p12, %p3834_p1 }
  0x30   : > { %3844 = shalt.err (!%p3841_p0)
}
  0x31   : > { %s4037_s24 = smov 192   ;;  %s4038_s16 = smov 12  }
  0x32   : > { %3476 = dma.hbm_to_vmem [thread:$0]  (!%p4176_p11), %s4873_s1, 12288, %s4169_s19, [#allocation7], %s4037_s24, %s4037_s24, %s4038_s16  }
  0x33   : > { %s3845_s27 = scalar_lea.hbm %s4850_s9, 2048 }
  0x34   : > { %p3846_p2 = scmp.ne.s32.totalorder %s4850_s9, %s3845_s27  ;;  %p3852_p10 = scmp.lt.u32.totalorder %s3845_s27, %s4850_s9 }
  0x36   : > { %p3848_p1 = pnand %p3846_p2, %p4190_p13 }
  0x38   : > { %p3849_p6 = pneg %p3848_p1 }
  0x3a   : > { %p3854_p3 = pnand %p3852_p10, %p3849_p6 }
  0x3c   : > { %3857 = shalt.err (!%p3854_p3)
}
  0x3d   : > { %s3858_s19 = scalar_lea.vmem %s4180_s22, 2048  ;;  %p3866_p12 = scmp.lt.s32.totalorder %s4180_s22, %s4180_s22 }
  0x3e   : > { %p3859_p5 = scmp.ne.s32.totalorder %s4180_s22, %s3858_s19  ;;  %p3867_p0 = scmp.lt.s32.totalorder %s3858_s19, %s3858_s19 }
  0x40   : > { %p3861_p7 = pnand %p3859_p5, %p4190_p13  ;;  %p3868_p2 = por %p3867_p0, %p3866_p12 }
  0x42   : > { %p3862_p9 = pneg %p3861_p7 }
  0x44   : > { %p3869_p1 = pnand %p3868_p2, %p3862_p9 }
  0x46   : > { %3872 = shalt.err (!%p3869_p1)
}
  0x47   : > { %s4861_s12 = smov 64   ;;  %s4862_s10 = smov 4  }
  0x48   : > { %3482 = dma.hbm_to_vmem [thread:$0]  (!%p4176_p11), %s4850_s9, 2048, %s4180_s22, [#allocation10], %s4861_s12, %s4861_s12, %s4862_s10  }
  0x49   : > { %s4041_s24 = smov [#allocation8]   ;;  %s3873_s14 = scalar_lea.hbm %s4848_s7, 4096 }
  0x4a   : > { %s382_s16 = sshll.u32 %s4041_s24, 4  ;;  %p3874_p6 = scmp.ne.s32.totalorder %s4848_s7, %s3873_s14  ;;  %s383_s16 = int_to_ptr.vmem [resolvable:$true] %s382_s16 }
  0x4b   : > { %p3880_p5 = scmp.lt.u32.totalorder %s3873_s14, %s4848_s7 }
  0x4c   : > { %p3876_p10 = pnand %p3874_p6, %p4190_p13 }
  0x4e   : > { %p3877_p3 = pneg %p3876_p10 }
  0x50   : > { %p3882_p7 = pnand %p3880_p5, %p3877_p3 }
  0x52   : > { %3885 = shalt.err (!%p3882_p7)
}
  0x53   : > { %s3886_s22 = scalar_lea.vmem %s383_s16, 4096  ;;  %p3894_p2 = scmp.lt.s32.totalorder %s383_s16, %s383_s16 }
  0x54   : > { %p3887_p9 = scmp.ne.s32.totalorder %s383_s16, %s3886_s22  ;;  %p3895_p1 = scmp.lt.s32.totalorder %s3886_s22, %s3886_s22 }
  0x56   : > { %p3889_p12 = pnand %p3887_p9, %p4190_p13  ;;  %p3896_p4 = por %p3895_p1, %p3894_p2 }
  0x58   : > { %p3890_p0 = pneg %p3889_p12 }
  0x5a   : > { %p3897_p8 = pnand %p3896_p4, %p3890_p0 }
  0x5c   : > { %3900 = shalt.err (!%p3897_p8)
}
  0x5d   : > { %s4042_s13 = smov 128   ;;  %s4043_s27 = smov 8  }
  0x5e   : > { %3479 = dma.hbm_to_vmem [thread:$0]  (!%p4176_p11), %s4848_s7, 4096, %s383_s16, [#allocation7], %s4042_s13, %s4042_s13, %s4043_s27  }
  0x5f   : > { %s4044_s25 = smov [#allocation11]   ;;  %s3901_s23 = scalar_lea.hbm %s4852_s11, 1024 }
  0x60   : > { %s414_s26 = sshll.u32 %s4044_s25, 4  ;;  %p3902_p4 = scmp.ne.s32.totalorder %s4852_s11, %s3901_s23  ;;  %s415_s26 = int_to_ptr.vmem [resolvable:$true] %s414_s26 }
  0x61   : > { %p3908_p10 = scmp.lt.u32.totalorder %s3901_s23, %s4852_s11 }
  0x62   : > { %p3904_p8 = pnand %p3902_p4, %p4190_p13 }
  0x64   : > { %p3905_p6 = pneg %p3904_p8 }
  0x66   : > { %p3910_p3 = pnand %p3908_p10, %p3905_p6 }
  0x68   : > { %3913 = shalt.err (!%p3910_p3)
}
  0x69   : > { %s3914_s16 = scalar_lea.vmem %s415_s26, 1024  ;;  %p3922_p12 = scmp.lt.s32.totalorder %s415_s26, %s415_s26 }
  0x6a   : > { %p3915_p5 = scmp.ne.s32.totalorder %s415_s26, %s3914_s16  ;;  %p3923_p0 = scmp.lt.s32.totalorder %s3914_s16, %s3914_s16 }
  0x6c   : > { %p3917_p7 = pnand %p3915_p5, %p4190_p13  ;;  %p3924_p2 = por %p3923_p0, %p3922_p12 }
  0x6e   : > { %p3918_p9 = pneg %p3917_p7 }
  0x70   : > { %p3925_p1 = pnand %p3924_p2, %p3918_p9 }
  0x72   : > { %3928 = shalt.err (!%p3925_p1)
}
  0x73   : > { %s4875_s13 = smov 4   ;;  %s4876_s27 = smov 64  }
  0x74   : > { %3485 = dma.hbm_to_vmem [thread:$0]  (!%p4176_p11), %s4852_s11, 1024, %s415_s26, [#allocation10], %s4876_s27, %s4876_s27, %s4875_s13  }
  0x75   : > { %s4277_s18 = sadd.s32 1, %s4033_s30   ;;  %s40_s20 = sadd.s32 1, %s4029_s29 }
  0x76   : > { %s37_s1 = ssub.s32 %s4033_s30, %s4277_s18  ;;  %p47_p13 = scmp.ne.s32.totalorder %s4029_s29, %s4025_s28 }
  0x77   : > { %p38_p4 = scmp.eq.s32.totalorder %s37_s1, 0  ;;  %p48_p8 = scmp.eq.s32.totalorder %s4033_s30, 0 }
  0x78   : > { %p4877_p6 = scmp.eq.s32.totalorder %s4146_s4, 1  ;;  %p3498_p3 = scmp.lt.s32.totalorder %s4033_s30, 2 }
  0x79   : > { %s4293_s25 = scalar_select %p38_p4, %s4029_s29, %s40_s20  }
  0x7a   : > { %p4287_p10 = por %p4877_p6, %p47_p13  ;;  %p49_p5 = por %p48_p8, %p47_p13 }
  0x7b   : > { %s431_s14 = sand.u32 1, %s4029_s29   ;;  %s3179_s26 = sshll.u32 %s4033_s30, 13 }
  0x7c   : > { %s2987_s21 = sshll.u32 %s431_s14, 9  ;;  %s4300_s22 = scalar_lea.hbm %s4841_s0, %s3179_s26 }
  0x7d   : > { %s435_s16 = scalar_lea.vmem [#allocation3], %s2987_s21  ;;  %p4304_p11 = pnand %p3498_p3, %p49_p5 }
  0x7e   : > { %s443_s13 = sshll.u32 %s435_s16, 4  ;;  %s4308_s12 = scalar_lea.sflag [#allocation4], %s431_s14  ;;  %s4302_s13 = int_to_ptr.vmem [resolvable:$true] %s443_s13 }
  0x7f   : > { %s3929_s10 = scalar_lea.hbm %s4300_s22, 8192  ;;  %p3931_p9 = pneg %p4304_p11 }
  0x80   : > { %p3930_p7 = scmp.ne.s32.totalorder %s4300_s22, %s3929_s10  ;;  %s3934_s21 = scalar_lea.hbm %s4841_s0, 16384 }
  0x81   : > { %p3935_p2 = scmp.lt.u32.totalorder %s4300_s22, %s4841_s0  ;;  %p3936_p1 = scmp.lt.u32.totalorder %s3934_s21, %s3929_s10 }
  0x82   : > { %p3932_p12 = pnand %p3931_p9, %p3930_p7  ;;  %p3938_p4 = scmp.lt.u32.totalorder %s3929_s10, %s4300_s22 }
  0x83   : > { %p3937_p13 = por %p3936_p1, %p3935_p2 }
  0x84   : > { %p3933_p0 = pneg %p3932_p12 }
  0x85   : > { %p3939_p8 = por %p3938_p4, %p3937_p13 }
  0x87   : > { %p3940_p6 = pnand %p3939_p8, %p3933_p0 }
  0x89   : > { %3943 = shalt.err (!%p3940_p6)
}
  0x8a   : > { %s3944_s14 = scalar_lea.vmem %s4302_s13, 8192  ;;  %s4045_s19 = smov [#allocation3]  }
  0x8b   : > { %p3945_p3 = scmp.ne.s32.totalorder %s4302_s13, %s3944_s14  ;;  %s3949_s16 = sshll.u32 %s4045_s19, 4  ;;  %s3950_s16 = int_to_ptr.vmem [resolvable:$false] %s3949_s16 }
  0x8c   : > { %s3951_s20 = scalar_lea.vmem %s3950_s16, 16384  ;;  %p3952_p12 = scmp.lt.s32.totalorder %s4302_s13, %s3950_s16 }
  0x8d   : > { %p3947_p5 = pnand %p3945_p3, %p3931_p9  ;;  %p3953_p2 = scmp.lt.s32.totalorder %s3951_s20, %s3944_s14 }
  0x8f   : > { %p3948_p7 = pneg %p3947_p5  ;;  %p3954_p1 = por %p3953_p2, %p3952_p12 }
  0x91   : > { %p3955_p13 = pnand %p3954_p1, %p3948_p7 }
  0x93   : > { %3958 = shalt.err (!%p3955_p13)
}
  0x94   : > { %s4046_s10 = smov 512   ;;  %s4047_s1 = smov 32  }
  0x95   : > { %3489 = dma.hbm_to_vmem [thread:$0]  (!%p4304_p11), %s4300_s22, 8192, %s4302_s13, %s4308_s12, %s4046_s10, %s4046_s10, %s4047_s1  }
  0x96   : > { %p4880_p9 = scmp.ne.s32.totalorder %s4871_s17, 0 }
  0x97   : > { %s4339_s21 = sand.u32 (!%p4880_p9), 1, %s4025_s28   ;;  %p4881_p0 = scmp.ne.s32.totalorder (!%p4880_p9), %s4868_s15, 0 }
  0x98   : > { %455 = sbr.rel (%p4880_p9) target bundleno = 1555 (0x613), region = 72  ;;  %s2992_s26 = sshll.u32 (!%p4880_p9), %s4339_s21, 9 }
  0x99   : > { %s458_s23 = scalar_lea.sflag (!%p4880_p9), [#allocation4], %s4339_s21  ;;  %s4343_s14 = scalar_lea.vmem (!%p4880_p9), [#allocation3], %s2992_s26 }
  0x9f   : > { %4004 = dma.done.wait (%p4881_p0), %s458_s23, 8192  }
  0xa0   : > { %4006 = vsyncadd (%p4881_p0), %s458_s23, 4294959104  ;;  %p4882_p11 = scmp.eq.s32.totalorder %s4146_s4, 0 }
  0xa2   : > { %4008 = dma.done.wait (%p4882_p11), [#allocation7], 16384   ;;  %p4883_p4 = pmov %p4882_p11 }
  0xa4   : > { %4010 = vsyncadd (%p4883_p4), [#allocation7], 4294950912  ;;  %p4884_p8 = pmov %p4883_p4 }
  0xa5   : > { %p4885_p6 = pmov %p4883_p4 }
  0xa6   : > { %4012 = dma.done.wait (%p4884_p8), [#allocation10], 3072  }
  0xa7   : > { %4014 = vsyncadd (%p4885_p6), [#allocation10], 4294964224  ;;  %v3553_v1 = vld [vmem:[#allocation6 + $0x4] ss:$12 sps:$4 sm:$0xff]   ;;  %v3555_v2 = vld [vmem:[#allocation6] ss:$12 sps:$4 sm:$0xff]  }
  0xa8   : > { %1259 = vmatprep.subr.bf16.mxu0 %v3553_v1  ;;  %v3556_v3 = vld [vmem:[#allocation6 + $0x1c] ss:$12 sps:$4 sm:$0xff]   ;;  %v3558_v4 = vld [vmem:[#allocation6 + $0x18] ss:$12 sps:$4 sm:$0xff]   ;;  %v3559_v5 = vld [vmem:[#allocation6 + $0x34] ss:$12 sps:$4 sm:$0xff]  }
  0xa9   : > { %1260 = vmatpush1.bf16.msra.mxu0 %v3555_v2  ;;  %v3561_v6 = vld [vmem:[#allocation6 + $0x30] ss:$12 sps:$4 sm:$0xff]   ;;  %v3562_v7 = vld [vmem:[#allocation6 + $0x4c] ss:$12 sps:$4 sm:$0xff]   ;;  %v3564_v8 = vld [vmem:[#allocation6 + $0x48] ss:$12 sps:$4 sm:$0xff]  }
  0xaa   : > { %1261 = vmatprep.subr.bf16.mxu0 %v3556_v3  ;;  %v3565_v9 = vld [vmem:[#allocation6 + $0x64] ss:$12 sps:$4 sm:$0xff]   ;;  %v3567_v10 = vld [vmem:[#allocation6 + $0x60] ss:$12 sps:$4 sm:$0xff]   ;;  %v3568_v11 = vld [vmem:[#allocation6 + $0x7c] ss:$12 sps:$4 sm:$0xff]  }
  0xab   : > { %v3570_v12 = vld [vmem:[#allocation6 + $0x78] ss:$12 sps:$4 sm:$0xff]   ;;  %v3571_v13 = vld [vmem:[#allocation6 + $0x94] ss:$12 sps:$4 sm:$0xff]   ;;  %v524_v14 = vld [vmem:[%s4343_s14 + $0x8] sm:$0xff]  ;;  %s4886_s23 = sld [smem:[#allocation20_spill]] }
  0xac   : > { %v528_v15 = vld [vmem:[%s4343_s14 + $0x28] sm:$0xff]  ;;  %v3573_v17 = vld [vmem:[#allocation6 + $0x90] ss:$12 sps:$4 sm:$0xff]   ;;  %v3582_v23 = vld [vmem:[#allocation6 + $0xd8] ss:$12 sps:$4 sm:$0xff]   ;;  %s4887_s22 = sld [smem:[#allocation21_spill]] }
  0xad   : > { %1262 = vmatpush1.bf16.msra.mxu0 %v3558_v4  ;;  %v588_v16 = vpack.c.bf16 %v528_v15, %v524_v14  ;;  %v3574_v18 = vld [vmem:[#allocation6 + $0xac] ss:$12 sps:$4 sm:$0xff]   ;;  %v3576_v19 = vld [vmem:[#allocation6 + $0xa8] ss:$12 sps:$4 sm:$0xff]   ;;  %v3577_v20 = vld [vmem:[#allocation6 + $0xc4] ss:$12 sps:$4 sm:$0xff]  }
  0xae   : > { %1263 = vmatprep.subr.bf16.mxu0 %v3559_v5  ;;  %v3579_v21 = vld [vmem:[#allocation6 + $0xc0] ss:$12 sps:$4 sm:$0xff]   ;;  %v3580_v22 = vld [vmem:[#allocation6 + $0xdc] ss:$12 sps:$4 sm:$0xff]   ;;  %v3589_v28 = vld [vmem:[#allocation6 + $0x124] ss:$12 sps:$4 sm:$0xff]  }
  0xaf   : > { %1291 = vmatprep.mubr.bf16.mxu0 %v588_v16  ;;  %1517 = vmatprep.mubr.bf16.mxu1 %v588_v16  ;;  %v3583_v24 = vld [vmem:[#allocation6 + $0xf4] ss:$12 sps:$4 sm:$0xff]   ;;  %v3585_v25 = vld [vmem:[#allocation6 + $0xf0] ss:$12 sps:$4 sm:$0xff]   ;;  %v3586_v26 = vld [vmem:[#allocation6 + $0x10c] ss:$12 sps:$4 sm:$0xff]  }
  0xb0   : > { %v3588_v27 = vld [vmem:[#allocation6 + $0x108] ss:$12 sps:$4 sm:$0xff]   ;;  %v3591_v29 = vld [vmem:[#allocation6 + $0x120] ss:$12 sps:$4 sm:$0xff]   ;;  %v3594_v31 = vld [vmem:[#allocation6 + $0x138] ss:$12 sps:$4 sm:$0xff]  }
  0xb1   : > { %1264 = vmatpush1.bf16.msra.mxu0 %v3561_v6  ;;  %v3592_v30 = vld [vmem:[#allocation6 + $0x13c] ss:$12 sps:$4 sm:$0xff]   ;;  %v3595_v32 = vld [vmem:[#allocation6 + $0x154] ss:$12 sps:$4 sm:$0xff]   ;;  %v3598_v34 = vld [vmem:[#allocation6 + $0x16c] ss:$12 sps:$4 sm:$0xff]  }
  0xb2   : > { %1265 = vmatprep.subr.bf16.mxu0 %v3562_v7  ;;  %v3597_v33 = vld [vmem:[#allocation6 + $0x150] ss:$12 sps:$4 sm:$0xff]   ;;  %v3600_v35 = vld [vmem:[#allocation6 + $0x168] ss:$12 sps:$4 sm:$0xff]   ;;  %v523_v36 = vld [vmem:[%s4343_s14] sm:$0xff]  ;;  %s3180_s27 = sshll.u32 %s4146_s4, 11 }
  0xb3   : > { %v527_v37 = vld [vmem:[%s4343_s14 + $0x20] sm:$0xff]  ;;  %v532_v39 = vld [vmem:[%s4343_s14 + $0x48] sm:$0xff]  ;;  %v3607_v57 = vld [vmem:[#allocation6 + $0x1b0] ss:$12 sps:$4 sm:$0xff]   ;;  %s4888_s20 = sld [smem:[#allocation22_spill]]  ;;  %s2856_s4 = scalar_lea.sflag [#allocation5], %s4339_s21 }
  0xb4   : > { %v3603_v38 = vld [vmem:[#allocation6 + $0x184] ss:$12 sps:$4 sm:$0xff]   ;;  %v536_v40 = vld [vmem:[%s4343_s14 + $0x68] sm:$0xff]  ;;  %v4363_v41 = vpack.c.bf16 %v527_v37, %v523_v36  ;;  %v3609_v50 = vld [vmem:[#allocation6 + $0x1b4] ss:$12 sps:$4 sm:$0xff]   ;;  %s4049_s26 = smov [#allocation12]  }
  0xb5   : > { %1266 = vmatpush1.bf16.msra.mxu0 %v3564_v8  ;;  %v3601_v42 = vld [vmem:[#allocation6 + $0x180] ss:$12 sps:$4 sm:$0xff]   ;;  %v3606_v43 = vld [vmem:[#allocation6 + $0x19c] ss:$12 sps:$4 sm:$0xff]   ;;  %v4365_v44 = vpack.c.bf16 %v536_v40, %v532_v39  ;;  %v3604_v46 = vld [vmem:[#allocation6 + $0x198] ss:$12 sps:$4 sm:$0xff]  }
  0xb6   : > { %1267 = vmatprep.subr.bf16.mxu0 %v3565_v9  ;;  %v3649_v45 = vld [vmem:[#allocation6 + $0xc8] ss:$12 sps:$4 sm:$0xff]   ;;  %v531_v47 = vld [vmem:[%s4343_s14 + $0x40] sm:$0xff]  ;;  %v3612_v58 = vld [vmem:[#allocation6 + $0x1cc] ss:$12 sps:$4 sm:$0xff]  }
  0xb7   : > { %v535_v48 = vld [vmem:[%s4343_s14 + $0x60] sm:$0xff]  ;;  %v3650_v49 = vld [vmem:[#allocation6 + $0x8] ss:$12 sps:$4 sm:$0xff]   ;;  %3181 = vmatprep.subr.bf16.mxu1 %v3649_v45  ;;  %v3655_v0 = vld [vmem:[#allocation6 + $0x110] ss:$12 sps:$4 sm:$0xff]  }
  0xb8   : > { %v540_v51 = vld [vmem:[%s4343_s14 + $0x88] sm:$0xff]  ;;  %3182 = vmatpush3.bf16.msra.mxu1 %v3650_v49  ;;  %v3653_v55 = vld [vmem:[#allocation6 + $0xf8] ss:$12 sps:$4 sm:$0xff]   ;;  %v4373_v56 = vpack.c.bf16 %v535_v48, %v531_v47  ;;  %v3656_v4 = vld [vmem:[#allocation6 + $0x50] ss:$12 sps:$4 sm:$0xff]  }
  0xb9   : > { %1268 = vmatpush1.bf16.msra.mxu0 %v3567_v10  ;;  %v3651_v52 = vld [vmem:[#allocation6 + $0xe0] ss:$12 sps:$4 sm:$0xff]   ;;  %v3654_v60 = vld [vmem:[#allocation6 + $0x38] ss:$12 sps:$4 sm:$0xff]   ;;  %v3610_v61 = vld [vmem:[#allocation6 + $0x1c8] ss:$12 sps:$4 sm:$0xff]   ;;  %s4792_s10 = scalar_lea.hbm %s4888_s20, %s3180_s27 }
  0xba   : > { %1269 = vmatprep.subr.bf16.mxu0 %v3568_v11  ;;  %v544_v53 = vld [vmem:[%s4343_s14 + $0xa8] sm:$0xff]  ;;  %3183 = vmatprep.subr.bf16.mxu1 %v3651_v52  ;;  %v539_v62 = vld [vmem:[%s4343_s14 + $0x80] sm:$0xff]  ;;  %v3631_v49 = vld [vmem:[#allocation6 + $0x270] ss:$12 sps:$4 sm:$0xff]  }
  0xbb   : > { %v3652_v54 = vld [vmem:[#allocation6 + $0x20] ss:$12 sps:$4 sm:$0xff]   ;;  %v4375_v59 = vpack.c.bf16 %v544_v53, %v540_v51  ;;  %v3615_v1 = vld [vmem:[#allocation6 + $0x1e4] ss:$12 sps:$4 sm:$0xff]   ;;  %v3657_v5 = vld [vmem:[#allocation6 + $0x128] ss:$12 sps:$4 sm:$0xff]  }
  0xbc   : > { %3184 = vmatpush3.bf16.msra.mxu1 %v3652_v54  ;;  %v543_v63 = vld [vmem:[%s4343_s14 + $0xa0] sm:$0xff]  ;;  %v548_v2 = vld [vmem:[%s4343_s14 + $0xc8] sm:$0xff] }
  0xbd   : > { %1270 = vmatpush1.bf16.msra.mxu0 %v3570_v12  ;;  %3185 = vmatprep.subr.bf16.mxu1 %v3653_v55  ;;  %v552_v3 = vld [vmem:[%s4343_s14 + $0xe8] sm:$0xff]  ;;  %v4383_v6 = vpack.c.bf16 %v543_v63, %v539_v62  ;;  %v3616_v11 = vld [vmem:[#allocation6 + $0x1f8] ss:$12 sps:$4 sm:$0xff]   ;;  %v3621_v15 = vld [vmem:[#allocation6 + $0x214] ss:$12 sps:$4 sm:$0xff]  }
  0xbe   : > { %1271 = vmatprep.subr.bf16.mxu0 %v3571_v13  ;;  %v3613_v7 = vld [vmem:[#allocation6 + $0x1e0] ss:$12 sps:$4 sm:$0xff]   ;;  %v3618_v8 = vld [vmem:[#allocation6 + $0x1fc] ss:$12 sps:$4 sm:$0xff]   ;;  %v4385_v9 = vpack.c.bf16 %v552_v3, %v548_v2  ;;  %v3628_v40 = vld [vmem:[#allocation6 + $0x258] ss:$12 sps:$4 sm:$0xff]  }
  0xbf   : > { %v3658_v10 = vld [vmem:[#allocation6 + $0x68] ss:$12 sps:$4 sm:$0xff]   ;;  %v547_v12 = vld [vmem:[%s4343_s14 + $0xc0] sm:$0xff]  ;;  %v3636_v51 = vld [vmem:[#allocation6 + $0x28c] ss:$12 sps:$4 sm:$0xff]  }
  0xc0   : > { %3186 = vmatpush3.bf16.msra.mxu1 %v3654_v60  ;;  %v551_v13 = vld [vmem:[%s4343_s14 + $0xe0] sm:$0xff]  ;;  %v556_v16 = vld [vmem:[%s4343_s14 + $0x108] sm:$0xff]  ;;  %v526_v3 = vld [vmem:[%s4343_s14 + $0x18] sm:$0xff] }
  0xc1   : > { %1272 = vmatpush1.bf16.msra.mxu0 %v3573_v17  ;;  %3187 = vmatprep.subr.bf16.mxu1 %v3655_v0  ;;  %v3659_v14 = vld [vmem:[#allocation6 + $0x140] ss:$12 sps:$4 sm:$0xff]   ;;  %v3630_v36 = vld [vmem:[#allocation6 + $0x25c] ss:$12 sps:$4 sm:$0xff]   ;;  %v3640_v63 = vld [vmem:[#allocation6 + $0x2b8] ss:$12 sps:$4 sm:$0xff]  }
  0xc2   : > { %1273 = vmatprep.subr.bf16.mxu0 %v3574_v18  ;;  %v560_v17 = vld [vmem:[%s4343_s14 + $0x128] sm:$0xff]  ;;  %v3633_v45 = vld [vmem:[#allocation6 + $0x274] ss:$12 sps:$4 sm:$0xff]  }
  0xc3   : > { %v3660_v18 = vld [vmem:[#allocation6 + $0x80] ss:$12 sps:$4 sm:$0xff]   ;;  %v3634_v53 = vld [vmem:[#allocation6 + $0x288] ss:$12 sps:$4 sm:$0xff]  }
  0xc4   : > { %3188 = vmatpush3.bf16.msra.mxu1 %v3656_v4  ;;  %v3667_v39 = vld [vmem:[#allocation6 + $0x260] ss:$12 sps:$4 sm:$0xff]   ;;  %v530_v4 = vld [vmem:[%s4343_s14 + $0x38] sm:$0xff] }
  0xc5   : > { %1274 = vmatpush1.bf16.msra.mxu0 %v3576_v19  ;;  %3189 = vmatprep.subr.bf16.mxu1 %v3657_v5  ;;  %v3661_v19 = vld [vmem:[#allocation6 + $0x158] ss:$12 sps:$4 sm:$0xff]   ;;  %v576_v47 = vld [vmem:[%s4343_s14 + $0x1a8] sm:$0xff]  ;;  %v3645_v2 = vld [vmem:[#allocation6 + $0x2d4] ss:$12 sps:$4 sm:$0xff]   ;;  %v590_v5 = vpack.c.bf16 %v530_v4, %v526_v3 }
  0xc6   : > { %1275 = vmatprep.subr.bf16.mxu0 %v3577_v20  ;;  %v3619_v20 = vld [vmem:[#allocation6 + $0x210] ss:$12 sps:$4 sm:$0xff]   ;;  %v3668_v48 = vld [vmem:[#allocation6 + $0x1a0] ss:$12 sps:$4 sm:$0xff]  }
  0xc7   : > { %v571_v54 = vld [vmem:[%s4343_s14 + $0x180] sm:$0xff]  ;;  %v4504_v3 = vld [vmem:[%s4843_s2] ss:$0 sm:$0xff] }
  0xc8   : > { %3190 = vmatpush3.bf16.msra.mxu1 %v3658_v10  ;;  %v575_v55 = vld [vmem:[%s4343_s14 + $0x1a0] sm:$0xff]  ;;  %v525_v10 = vld [vmem:[%s4343_s14 + $0x10] sm:$0xff] }
  0xc9   : > { %1276 = vmatpush1.bf16.msra.mxu0 %v3579_v21  ;;  %3191 = vmatprep.subr.bf16.mxu1 %v3659_v14  ;;  %v4393_v21 = vpack.c.bf16 %v551_v13, %v547_v12  ;;  %v611_v60 = vpack.c.bf16 %v575_v55, %v571_v54  ;;  %v579_v0 = vld [vmem:[%s4343_s14 + $0x1c0] sm:$0xff]  ;;  %v538_v12 = vld [vmem:[%s4343_s14 + $0x78] sm:$0xff]  ;;  %v533_v14 = vld [vmem:[%s4343_s14 + $0x50] sm:$0xff] }
  0xca   : > { %1277 = vmatprep.subr.bf16.mxu0 %v3580_v22  ;;  %v3624_v22 = vld [vmem:[#allocation6 + $0x22c] ss:$12 sps:$4 sm:$0xff]  }
  0xcb   : > { %v3669_v55 = vld [vmem:[#allocation6 + $0x278] ss:$12 sps:$4 sm:$0xff]  }
  0xcc   : > { %3192 = vmatpush3.bf16.msra.mxu1 %v3660_v18 }
  0xcd   : > { %1278 = vmatpush1.bf16.msra.mxu0 %v3582_v23  ;;  %v3662_v23 = vld [vmem:[#allocation6 + $0x98] ss:$12 sps:$4 sm:$0xff]   ;;  %3193 = vmatprep.subr.bf16.mxu1 %v3661_v19 }
  0xce   : > { %1279 = vmatprep.subr.bf16.mxu0 %v3583_v24  ;;  %v4395_v24 = vpack.c.bf16 %v560_v17, %v556_v16  ;;  %v542_v16 = vld [vmem:[%s4343_s14 + $0x98] sm:$0xff] }
  0xcf   : > { %v546_v17 = vld [vmem:[%s4343_s14 + $0xb8] sm:$0xff] }
  0xd0   : > { %3194 = vmatpush3.bf16.msra.mxu1 %v3662_v23  ;;  %v4453_v19 = vpack.c.bf16 %v546_v17, %v542_v16  ;;  %v554_v23 = vld [vmem:[%s4343_s14 + $0xf8] sm:$0xff] }
  0xd1   : > { %1280 = vmatpush1.bf16.msra.mxu0 %v3585_v25  ;;  %v3663_v25 = vld [vmem:[#allocation6 + $0x170] ss:$12 sps:$4 sm:$0xff]  }
  0xd2   : > { %1281 = vmatprep.subr.bf16.mxu0 %v3586_v26  ;;  %v3622_v26 = vld [vmem:[#allocation6 + $0x228] ss:$12 sps:$4 sm:$0xff]   ;;  %3195 = vmatprep.subr.bf16.mxu1 %v3663_v25 }
  0xd5   : > { %1282 = vmatpush1.bf16.msra.mxu0 %v3588_v27  ;;  %v555_v27 = vld [vmem:[%s4343_s14 + $0x100] sm:$0xff] }
  0xd6   : > { %1283 = vmatprep.subr.bf16.mxu0 %v3589_v28  ;;  %v559_v28 = vld [vmem:[%s4343_s14 + $0x120] sm:$0xff] }
  0xd9   : > { %1284 = vmatpush1.bf16.msra.mxu0 %v3591_v29  ;;  %v3627_v29 = vld [vmem:[#allocation6 + $0x244] ss:$12 sps:$4 sm:$0xff]  }
  0xda   : > { %1285 = vmatprep.subr.bf16.mxu0 %v3592_v30  ;;  %v564_v30 = vld [vmem:[%s4343_s14 + $0x148] sm:$0xff] }
  0xdd   : > { %1286 = vmatpush1.bf16.msra.mxu0 %v3594_v31  ;;  %v568_v31 = vld [vmem:[%s4343_s14 + $0x168] sm:$0xff] }
  0xde   : > { %1287 = vmatprep.subr.bf16.mxu0 %v3595_v32  ;;  %v3664_v32 = vld [vmem:[#allocation6 + $0xb0] ss:$12 sps:$4 sm:$0xff]   ;;  %v4405_v37 = vpack.c.bf16 %v568_v31, %v564_v30 }
  0xdf   : > { %3196 = vmatpush3.bf16.msra.mxu1 %v3664_v32  ;;  %v557_v32 = vld [vmem:[%s4343_s14 + $0x110] sm:$0xff] }
  0xe1   : > { %1288 = vmatpush1.bf16.msra.mxu0 %v3597_v33  ;;  %v3665_v33 = vld [vmem:[#allocation6 + $0x248] ss:$12 sps:$4 sm:$0xff]  }
  0xe2   : > { %1289 = vmatprep.subr.bf16.mxu0 %v3598_v34  ;;  %v3625_v34 = vld [vmem:[#allocation6 + $0x240] ss:$12 sps:$4 sm:$0xff]   ;;  %3245 = vmatprep.subr.bf16.mxu1 %v3665_v33  ;;  %v561_v33 = vld [vmem:[%s4343_s14 + $0x130] sm:$0xff] }
  0xe3   : > { %1518 = vmatmul.mubr.bf16.vlgmr.msra.gmra.mrb[0].mxu1 %v4363_v41 }
  0xe4   : > { %1525 = vmatprep.mubr.bf16.mxu1 %v4365_v44 }
  0xe5   : > { %1290 = vmatpush1.bf16.msra.mxu0 %v3600_v35  ;;  %v4403_v35 = vpack.c.bf16 %v559_v28, %v555_v27  ;;  %v553_v27 = vld [vmem:[%s4343_s14 + $0xf0] sm:$0xff]  ;;  %v558_v28 = vld [vmem:[%s4343_s14 + $0x118] sm:$0xff] }
  0xe6   : > { %1372 = vmatprep.subr.bf16.mxu0 %v3603_v38  ;;  %v3666_v38 = vld [vmem:[#allocation6 + $0x188] ss:$12 sps:$4 sm:$0xff]  }
  0xe7   : > { %3246 = vmatpush3.bf16.msra.mxu1 %v3666_v38  ;;  %v565_v38 = vld [vmem:[%s4343_s14 + $0x150] sm:$0xff] }
  0xe8   : > { %1292 = vmatmul.mubr.bf16.vlgmr.msra.gmra.mrb[0].mxu0 %v4363_v41  ;;  %3247 = vmatprep.subr.bf16.mxu1 %v3667_v39  ;;  %v3639_v41 = vld [vmem:[#allocation6 + $0x2a4] ss:$12 sps:$4 sm:$0xff]  }
  0xe9   : > { %1373 = vmatpush1.bf16.msra.mxu0 %v3601_v42  ;;  %1301 = vmatprep.mubr.bf16.mxu0 %v4365_v44  ;;  %v563_v42 = vld [vmem:[%s4343_s14 + $0x140] sm:$0xff]  ;;  %v584_v44 = vld [vmem:[%s4343_s14 + $0x1e8] sm:$0xff]  ;;  %v569_v39 = vld [vmem:[%s4343_s14 + $0x170] sm:$0xff] }
  0xea   : > { %1374 = vmatprep.subr.bf16.mxu0 %v3606_v43  ;;  %v567_v43 = vld [vmem:[%s4343_s14 + $0x160] sm:$0xff] }
  0xeb   : > { %3248 = vmatpush3.bf16.msra.mxu1 %v3668_v48  ;;  %v582_v48 = vld [vmem:[%s4343_s14 + $0x1d8] sm:$0xff] }
  0xec   : > { %1526 = vmatmul.mubr.bf16.gmra.mrb[4].mxu1 %v4373_v56  ;;  %3249 = vmatprep.subr.bf16.mxu1 %v3669_v55 }
  0xed   : > { %1375 = vmatpush1.bf16.msra.mxu0 %v3604_v46  ;;  %v572_v46 = vld [vmem:[%s4343_s14 + $0x188] sm:$0xff]  ;;  %1533 = vmatprep.mubr.bf16.mxu1 %v4375_v59 }
  0xee   : > { %1376 = vmatprep.subr.bf16.mxu0 %v3609_v50  ;;  %v4415_v50 = vpack.c.bf16 %v567_v43, %v563_v42  ;;  %v4417_v52 = vpack.c.bf16 %v576_v47, %v572_v46  ;;  %v578_v42 = vld [vmem:[%s4343_s14 + $0x1b8] sm:$0xff]  ;;  %v609_v43 = vpack.c.bf16 %v569_v39, %v565_v38  ;;  %v573_v46 = vld [vmem:[%s4343_s14 + $0x190] sm:$0xff] }
  0xef   : > { %v577_v47 = vld [vmem:[%s4343_s14 + $0x1b0] sm:$0xff] }
  0xf0   : > { %1302 = vmatmul.mubr.bf16.gmra.mrb[4].mxu0 %v4373_v56 }
  0xf1   : > { %1377 = vmatpush1.bf16.msra.mxu0 %v3607_v57  ;;  %1311 = vmatprep.mubr.bf16.mxu0 %v4375_v59  ;;  %v580_v57 = vld [vmem:[%s4343_s14 + $0x1c8] sm:$0xff]  ;;  %v3643_v59 = vld [vmem:[#allocation6 + $0x2d0] ss:$12 sps:$4 sm:$0xff]  }
  0xf2   : > { %1378 = vmatprep.subr.bf16.mxu0 %v3612_v58  ;;  %v3637_v58 = vld [vmem:[#allocation6 + $0x2a0] ss:$12 sps:$4 sm:$0xff]   ;;  %v616_v62 = vpack.c.bf16 %v584_v44, %v580_v57  ;;  %v3671_v57 = vld [vmem:[#allocation6 + $0x290] ss:$12 sps:$4 sm:$0xff]  }
  0xf3   : > { %v3672_v44 = vld [vmem:[#allocation6 + $0x1d0] ss:$12 sps:$4 sm:$0xff]  }
  0xf4   : > { %1534 = vmatmul.mubr.bf16.gmra.mrb[8].mxu1 %v4383_v6 }
  0xf5   : > { %1379 = vmatpush1.bf16.msra.mxu0 %v3610_v61  ;;  %v3642_v61 = vld [vmem:[#allocation6 + $0x2bc] ss:$12 sps:$4 sm:$0xff]   ;;  %1541 = vmatprep.mubr.bf16.mxu1 %v4385_v9 }
  0xf6   : > { %1380 = vmatprep.subr.bf16.mxu0 %v3615_v1  ;;  %v583_v1 = vld [vmem:[%s4343_s14 + $0x1e0] sm:$0xff] }
  0xf7   : > { %v615_v56 = vpack.c.bf16 %v583_v1, %v579_v0  ;;  %v3678_v0 = vld [vmem:[#allocation6 + $0x218] ss:$12 sps:$4 sm:$0xff]   ;;  %v3679_v1 = vld [vmem:[#allocation6 + $0x2f0] ss:$12 sps:$4 sm:$0xff]  }
  0xf8   : > { %1312 = vmatmul.mubr.bf16.gmra.mrb[8].mxu0 %v4383_v6  ;;  %v534_v6 = vld [vmem:[%s4343_s14 + $0x58] sm:$0xff] }
  0xf9   : > { %1381 = vmatpush1.bf16.msra.mxu0 %v3613_v7  ;;  %1321 = vmatprep.mubr.bf16.mxu0 %v4385_v9  ;;  %v3648_v7 = vld [vmem:[#allocation6 + $0x2ec] ss:$12 sps:$4 sm:$0xff]   ;;  %v4441_v13 = vpack.c.bf16 %v538_v12, %v534_v6 }
  0xfa   : > { %1382 = vmatprep.subr.bf16.mxu0 %v3618_v8  ;;  %v3646_v8 = vld [vmem:[#allocation6 + $0x2e8] ss:$12 sps:$4 sm:$0xff]  }
  0xfc   : > { %1542 = vmatmul.mubr.bf16.gmra.mrb[12].mxu1 %v4393_v21 }
  0xfd   : > { %1383 = vmatpush1.bf16.msra.mxu0 %v3616_v11  ;;  %v529_v11 = vld [vmem:[%s4343_s14 + $0x30] sm:$0xff]  ;;  %1549 = vmatprep.mubr.bf16.mxu1 %v4395_v24 }
  0xfe   : > { %1384 = vmatprep.subr.bf16.mxu0 %v3621_v15  ;;  %v4439_v9 = vpack.c.bf16 %v529_v11, %v525_v10  ;;  %v537_v15 = vld [vmem:[%s4343_s14 + $0x70] sm:$0xff] }
  0xff   : > { %v4451_v18 = vpack.c.bf16 %v537_v15, %v533_v14 }
 0x100   : > { %1322 = vmatmul.mubr.bf16.gmra.mrb[12].mxu0 %v4393_v21  ;;  %v545_v21 = vld [vmem:[%s4343_s14 + $0xb0] sm:$0xff] }
 0x101   : > { %1385 = vmatpush1.bf16.msra.mxu0 %v3619_v20  ;;  %1331 = vmatprep.mubr.bf16.mxu0 %v4395_v24  ;;  %v541_v20 = vld [vmem:[%s4343_s14 + $0x90] sm:$0xff] }
 0x102   : > { %1386 = vmatprep.subr.bf16.mxu0 %v3624_v22  ;;  %v550_v22 = vld [vmem:[%s4343_s14 + $0xd8] sm:$0xff]  ;;  %v4463_v24 = vpack.c.bf16 %v545_v21, %v541_v20 }
 0x103   : > { %v4465_v25 = vpack.c.bf16 %v554_v23, %v550_v22 }
 0x104   : > { %1550 = vmatmul.mubr.bf16.gmra.mrb[16].mxu1 %v4403_v35 }
 0x105   : > { %1387 = vmatpush1.bf16.msra.mxu0 %v3622_v26  ;;  %1557 = vmatprep.mubr.bf16.mxu1 %v4405_v37  ;;  %v549_v26 = vld [vmem:[%s4343_s14 + $0xd0] sm:$0xff] }
 0x106   : > { %1388 = vmatprep.subr.bf16.mxu0 %v3627_v29  ;;  %v562_v29 = vld [vmem:[%s4343_s14 + $0x138] sm:$0xff]  ;;  %v4473_v30 = vpack.c.bf16 %v553_v27, %v549_v26 }
 0x107   : > { %v4475_v31 = vpack.c.bf16 %v562_v29, %v558_v28 }
 0x108   : > { %1332 = vmatmul.mubr.bf16.gmra.mrb[16].mxu0 %v4403_v35  ;;  %v570_v35 = vld [vmem:[%s4343_s14 + $0x178] sm:$0xff] }
 0x109   : > { %1389 = vmatpush1.bf16.msra.mxu0 %v3625_v34  ;;  %1341 = vmatprep.mubr.bf16.mxu0 %v4405_v37  ;;  %v566_v34 = vld [vmem:[%s4343_s14 + $0x158] sm:$0xff] }
 0x10a   : > { %1390 = vmatprep.subr.bf16.mxu0 %v3630_v36  ;;  %v605_v36 = vpack.c.bf16 %v561_v33, %v557_v32  ;;  %v610_v37 = vpack.c.bf16 %v570_v35, %v566_v34 }
 0x10c   : > { %1558 = vmatmul.mubr.bf16.gmra.mrb[20].mxu1 %v4415_v50 }
 0x10d   : > { %1391 = vmatpush1.bf16.msra.mxu0 %v3628_v40  ;;  %1565 = vmatprep.mubr.bf16.mxu1 %v4417_v52  ;;  %v574_v40 = vld [vmem:[%s4343_s14 + $0x198] sm:$0xff] }
 0x10e   : > { %1392 = vmatprep.subr.bf16.mxu0 %v3633_v45  ;;  %v614_v45 = vpack.c.bf16 %v578_v42, %v574_v40 }
 0x110   : > { %1342 = vmatmul.mubr.bf16.gmra.mrb[20].mxu0 %v4415_v50  ;;  %v613_v50 = vpack.c.bf16 %v577_v47, %v573_v46 }
 0x111   : > { %1393 = vmatpush1.bf16.msra.mxu0 %v3631_v49  ;;  %1351 = vmatprep.mubr.bf16.mxu0 %v4417_v52  ;;  %v586_v49 = vld [vmem:[%s4343_s14 + $0x1f8] sm:$0xff]  ;;  %v581_v52 = vld [vmem:[%s4343_s14 + $0x1d0] sm:$0xff] }
 0x112   : > { %1394 = vmatprep.subr.bf16.mxu0 %v3636_v51  ;;  %v618_v51 = vpack.c.bf16 %v586_v49, %v582_v48 }
 0x114   : > { %1566 = vmatmul.mubr.bf16.gmra.mrb[24].mxu1 %v611_v60 }
 0x115   : > { %1395 = vmatpush1.bf16.msra.mxu0 %v3634_v53  ;;  %1573 = vmatprep.mubr.bf16.mxu1 %v616_v62  ;;  %v585_v53 = vld [vmem:[%s4343_s14 + $0x1f0] sm:$0xff]  ;;  %s2997_s14 = sshll.u32 %s4339_s21, 7 }
 0x116   : > { %1396 = vmatprep.subr.bf16.mxu0 %v3639_v41  ;;  %v617_v54 = vpack.c.bf16 %v585_v53, %v581_v52  ;;  %v3670_v41 = vld [vmem:[#allocation6 + $0x1b8] ss:$12 sps:$4 sm:$0xff]   ;;  %s4772_s13 = scalar_lea.vmem [#allocation12], %s2997_s14 }
 0x117   : > { %3250 = vmatpush3.bf16.msra.mxu1 %v3670_v41  ;;  %s2869_s12 = sshll.u32 %s4772_s13, 4  ;;  %s4794_s12 = int_to_ptr.vmem [resolvable:$true] %s2869_s12 }
 0x118   : > { %1352 = vmatmul.mubr.bf16.gmra.mrb[24].mxu0 %v611_v60  ;;  %3251 = vmatprep.subr.bf16.mxu1 %v3671_v57  ;;  %v3674_v60 = vld [vmem:[#allocation6 + $0x1e8] ss:$12 sps:$4 sm:$0xff]   ;;  %s3959_s1 = scalar_lea.vmem %s4794_s12, 2048 }
 0x119   : > { %1397 = vmatpush1.bf16.msra.mxu0 %v3637_v58  ;;  %1361 = vmatprep.mubr.bf16.mxu0 %v616_v62  ;;  %v3673_v58 = vld [vmem:[#allocation6 + $0x2a8] ss:$12 sps:$4 sm:$0xff]   ;;  %v3676_v62 = vld [vmem:[#allocation6 + $0x200] ss:$12 sps:$4 sm:$0xff]   ;;  %p3960_p3 = scmp.ne.s32.totalorder %s4794_s12, %s3959_s1 }
 0x11a   : > { %1398 = vmatprep.subr.bf16.mxu0 %v3642_v61  ;;  %v3675_v61 = vld [vmem:[#allocation6 + $0x2c0] ss:$12 sps:$4 sm:$0xff]  }
 0x11b   : > { %3252 = vmatpush3.bf16.msra.mxu1 %v3672_v44  ;;  %p3961_p5 = pnand %p3960_p3, %p4287_p10 }
 0x11c   : > { %1574 = vmatmul.mubr.bf16.gmra.mrb[28].mxu1 %v615_v56  ;;  %3253 = vmatprep.subr.bf16.mxu1 %v3673_v58 }
 0x11d   : > { %1399 = vmatpush1.bf16.msra.mxu0 %v3640_v63  ;;  %1614 = vmatprep.mubr.bf16.mxu1 %v590_v5  ;;  %v3677_v63 = vld [vmem:[#allocation6 + $0x2d8] ss:$12 sps:$4 sm:$0xff]   ;;  %p3962_p7 = pneg %p3961_p5 }
 0x11e   : > { %1400 = vmatprep.subr.bf16.mxu0 %v3645_v2  ;;  %v3680_v2 = vld [vmem:[#allocation6 + $0x230] ss:$12 sps:$4 sm:$0xff]  }
 0x11f   : > { %3254 = vmatpush3.bf16.msra.mxu1 %v3674_v60 }
 0x120   : > { %1362 = vmatmul.mubr.bf16.gmra.mrb[28].mxu0 %v615_v56  ;;  %3255 = vmatprep.subr.bf16.mxu1 %v3675_v61 }
 0x121   : > { %1401 = vmatpush1.bf16.msra.mxu0 %v3643_v59  ;;  %1404 = vmatprep.mubr.bf16.mxu0 %v590_v5 }
 0x122   : > { %1402 = vmatprep.subr.bf16.mxu0 %v3648_v7  ;;  %v4512_v7 = vld [vmem:[%s4844_s3] ss:$0 sm:$0xff] }
 0x123   : > { %3256 = vmatpush3.bf16.msra.mxu1 %v3676_v62 }
 0x124   : > { %3257 = vmatprep.subr.bf16.mxu1 %v3677_v63 }
 0x125   : > { %1403 = vmatpush1.bf16.msra.mxu0 %v3646_v8 }
 0x127   : > { %3258 = vmatpush3.bf16.msra.mxu1 %v3678_v0 }
 0x128   : > { %1405 = vmatmul.mubr.bf16.vlgmr.msra.gmra.mrb[0].mxu0 %v4439_v9  ;;  %3259 = vmatprep.subr.bf16.mxu1 %v3679_v1 }
 0x129   : > { %1414 = vmatprep.mubr.bf16.mxu0 %v4441_v13 }
 0x12b   : > { %3260 = vmatpush3.bf16.msra.mxu1 %v3680_v2  ;;  %v4048_v2 = vmov 0  }
 0x12c   : > { %3551 = vset.pattern.permute.xlu0 %v4048_v2  ;;  %3552 = vset.pattern.permute.xlu1 %v4048_v2 }
 0x12e   : > { %1615 = vmatmul.mubr.bf16.vlgmr.msra.gmra.mrb[32].mxu1 %v4439_v9 }
 0x12f   : > { %1622 = vmatprep.mubr.bf16.mxu1 %v4441_v13 }
 0x130   : > { %1415 = vmatmul.mubr.bf16.gmra.mrb[4].mxu0 %v4451_v18 }
 0x131   : > { %1424 = vmatprep.mubr.bf16.mxu0 %v4453_v19 }
 0x136   : > { %1623 = vmatmul.mubr.bf16.gmra.mrb[36].mxu1 %v4451_v18 }
 0x137   : > { %1630 = vmatprep.mubr.bf16.mxu1 %v4453_v19 }
 0x138   : > { %1425 = vmatmul.mubr.bf16.gmra.mrb[8].mxu0 %v4463_v24 }
 0x139   : > { %1434 = vmatprep.mubr.bf16.mxu0 %v4465_v25 }
 0x13e   : > { %1631 = vmatmul.mubr.bf16.gmra.mrb[40].mxu1 %v4463_v24 }
 0x13f   : > { %1638 = vmatprep.mubr.bf16.mxu1 %v4465_v25 }
 0x140   : > { %1435 = vmatmul.mubr.bf16.gmra.mrb[12].mxu0 %v4473_v30 }
 0x141   : > { %1444 = vmatprep.mubr.bf16.mxu0 %v4475_v31 }
 0x146   : > { %1639 = vmatmul.mubr.bf16.gmra.mrb[44].mxu1 %v4473_v30 }
 0x147   : > { %1646 = vmatprep.mubr.bf16.mxu1 %v4475_v31 }
 0x148   : > { %1445 = vmatmul.mubr.bf16.gmra.mrb[16].mxu0 %v605_v36 }
 0x149   : > { %1454 = vmatprep.mubr.bf16.mxu0 %v610_v37 }
 0x14e   : > { %1647 = vmatmul.mubr.bf16.gmra.mrb[48].mxu1 %v605_v36 }
 0x14f   : > { %1654 = vmatprep.mubr.bf16.mxu1 %v610_v37 }
 0x150   : > { %1455 = vmatmul.mubr.bf16.gmra.mrb[20].mxu0 %v609_v43 }
 0x151   : > { %1464 = vmatprep.mubr.bf16.mxu0 %v614_v45 }
 0x156   : > { %1655 = vmatmul.mubr.bf16.gmra.mrb[52].mxu1 %v609_v43 }
 0x157   : > { %1662 = vmatprep.mubr.bf16.mxu1 %v614_v45 }
 0x158   : > { %1465 = vmatmul.mubr.bf16.gmra.mrb[24].mxu0 %v613_v50 }
 0x159   : > { %1474 = vmatprep.mubr.bf16.mxu0 %v618_v51 }
 0x15e   : > { %1663 = vmatmul.mubr.bf16.gmra.mrb[56].mxu1 %v613_v50 }
 0x15f   : > { %1670 = vmatprep.mubr.bf16.mxu1 %v618_v51 }
 0x160   : > { %1475 = vmatmul.mubr.bf16.gmra.mrb[28].mxu0 %v617_v54 }
 0x166   : > { %1671 = vmatmul.mubr.bf16.gmra.mrb[60].mxu1 %v617_v54 }
 0x1fb   : > { %v1406_v4 = vpop.f32.mrb[0].mxu0 }
 0x1fc   : > { %v1686_v56 = vadd.f32 %v4504_v3, %v1406_v4  ;;  %v4507_v59 = vpop.f32.mrb[1].mxu0 }
 0x1fd   : > { %v1410_v5 = vpop.f32.mrb[2].mxu0 }
 0x1fe   : > { %v1702_v8 = vmax.f32 %v1686_v56, 0.0  ;;  %v1687_v10 = vadd.f32 %v4504_v3, %v1410_v5  ;;  %v4515_v11 = vpop.f32.mrb[3].mxu0 }
 0x200   : > { %v1703_v6 = vmax.f32 %v1687_v10, 0.0  ;;  %v1725_v12 = vmul.f32 %v4512_v7, %v1702_v8 }
 0x202   : > { %1741 = vadd.xlane.f32.xlu0 %v1725_v12  ;;  %v1726_v15 = vmul.f32 %v4512_v7, %v1703_v6 }
 0x203   : > { %v1416_v9 = vpop.f32.mrb[4].mxu0 }
 0x204   : > { %v1688_v13 = vadd.f32 %v4504_v3, %v1416_v9  ;;  %v4519_v14 = vpop.f32.mrb[5].mxu0 }
 0x205   : > { %v1420_v16 = vpop.f32.mrb[6].mxu0 }
 0x206   : > { %v1704_v17 = vmax.f32 %v1688_v13, 0.0  ;;  %v1689_v18 = vadd.f32 %v4504_v3, %v1420_v16  ;;  %1743 = vadd.xlane.f32.xlu0 %v1726_v15  ;;  %v4523_v19 = vpop.f32.mrb[7].mxu0 }
 0x208   : > { %v1705_v20 = vmax.f32 %v1689_v18, 0.0  ;;  %v1727_v21 = vmul.f32 %v4512_v7, %v1704_v17 }
 0x20a   : > { %1745 = vadd.xlane.f32.xlu1 %v1727_v21  ;;  %v1728_v25 = vmul.f32 %v4512_v7, %v1705_v20 }
 0x20b   : > { %v1426_v22 = vpop.f32.mrb[8].mxu0 }
 0x20c   : > { %v1690_v23 = vadd.f32 %v4504_v3, %v1426_v22  ;;  %v4527_v24 = vpop.f32.mrb[9].mxu0 }
 0x20d   : > { %v1430_v26 = vpop.f32.mrb[10].mxu0 }
 0x20e   : > { %v1706_v27 = vmax.f32 %v1690_v23, 0.0  ;;  %v1691_v28 = vadd.f32 %v4504_v3, %v1430_v26  ;;  %1747 = vadd.xlane.f32.xlu1 %v1728_v25  ;;  %v4531_v29 = vpop.f32.mrb[11].mxu0 }
 0x210   : > { %v1707_v30 = vmax.f32 %v1691_v28, 0.0  ;;  %v1729_v31 = vmul.f32 %v4512_v7, %v1706_v27  ;;  %v3197_v27 = vpop.f32.mrb[0].mxu1 }
 0x211   : > { %v3198_v28 = vpop.f32.mrb[1].mxu1 }
 0x212   : > { %1749 = vadd.xlane.f32.xlu0 %v1729_v31  ;;  %v1730_v32 = vmul.f32 %v4512_v7, %v1707_v30  ;;  %v3200_v30 = vpop.f32.mrb[2].mxu1 }
 0x213   : > { %v1436_v33 = vpop.f32.mrb[12].mxu0  ;;  %v3201_v31 = vpop.f32.mrb[3].mxu1 }
 0x214   : > { %v1692_v34 = vadd.f32 %v4504_v3, %v1436_v33  ;;  %1751 = vadd.xlane.f32.xlu1 %v1730_v32  ;;  %v4536_v35 = vpop.f32.mrb[13].mxu0  ;;  %v3203_v32 = vpop.f32.mrb[4].mxu1 }
 0x215   : > { %v1440_v36 = vpop.f32.mrb[14].mxu0  ;;  %v3204_v33 = vpop.f32.mrb[5].mxu1 }
 0x216   : > { %v1708_v37 = vmax.f32 %v1692_v34, 0.0  ;;  %v1693_v38 = vadd.f32 %v4504_v3, %v1440_v36  ;;  %v4539_v39 = vpop.f32.mrb[15].mxu0  ;;  %v3206_v34 = vpop.f32.mrb[6].mxu1 }
 0x217   : > { %v3207_v36 = vpop.f32.mrb[7].mxu1 }
 0x218   : > { %v1709_v40 = vmax.f32 %v1693_v38, 0.0  ;;  %v1731_v42 = vmul.f32 %v4512_v7, %v1708_v37  ;;  %v3209_v37 = vpop.f32.mrb[8].mxu1 }
 0x219   : > { %v3210_v38 = vpop.f32.mrb[9].mxu1 }
 0x21a   : > { %1753 = vadd.xlane.f32.xlu0 %v1731_v42  ;;  %v1732_v43 = vmul.f32 %v4512_v7, %v1709_v40 }
 0x21b   : > { %v1446_v45 = vpop.f32.mrb[16].mxu0 }
 0x21c   : > { %v1694_v46 = vadd.f32 %v4504_v3, %v1446_v45  ;;  %1755 = vadd.xlane.f32.xlu1 %v1732_v43  ;;  %v4544_v47 = vpop.f32.mrb[17].mxu0 }
 0x21d   : > { %v1450_v48 = vpop.f32.mrb[18].mxu0 }
 0x21e   : > { %v1710_v49 = vmax.f32 %v1694_v46, 0.0  ;;  %v1695_v50 = vadd.f32 %v4504_v3, %v1450_v48  ;;  %v4547_v51 = vpop.f32.mrb[19].mxu0 }
 0x220   : > { %v1711_v52 = vmax.f32 %v1695_v50, 0.0  ;;  %v1733_v53 = vmul.f32 %v4512_v7, %v1710_v49  ;;  %v3199_v50 = vadd.f32 %v3198_v28, %v3197_v27  ;;  %v3681_v28 = vld [vmem:[#allocation8] ss:$8 sps:$4 sm:$0xff]  }
 0x222   : > { %1757 = vadd.xlane.f32.xlu0 %v1733_v53  ;;  %v1734_v54 = vmul.f32 %v4512_v7, %v1711_v52 }
 0x223   : > { %v1456_v55 = vpop.f32.mrb[20].mxu0 }
 0x224   : > { %v1696_v41 = vadd.f32 %v4504_v3, %v1456_v55  ;;  %1759 = vadd.xlane.f32.xlu1 %v1734_v54  ;;  %v4552_v57 = vpop.f32.mrb[21].mxu0  ;;  %v3202_v54 = vadd.f32 %v3201_v31, %v3200_v30  ;;  %v3205_v55 = vadd.f32 %v3204_v33, %v3203_v32  ;;  %v3683_v31 = vld [vmem:[#allocation8 + $0x4] ss:$8 sps:$4 sm:$0xff]  }
 0x225   : > { %v1460_v44 = vpop.f32.mrb[22].mxu0  ;;  %2286 = vmatprep.subr.bf16.mxu1 %v3683_v31  ;;  %v3698_v31 = vld [vmem:[#allocation8 + $0x54] ss:$8 sps:$4 sm:$0xff]  }
 0x226   : > { %v1712_v58 = vmax.f32 %v1696_v41, 0.0  ;;  %v1697_v60 = vadd.f32 %v4504_v3, %v1460_v44  ;;  %v4555_v61 = vpop.f32.mrb[23].mxu0  ;;  %v3208_v41 = vadd.f32 %v3207_v36, %v3206_v34  ;;  %v4575_v44 = vadd.f32 %v3210_v38, %v3209_v37  ;;  %v3686_v34 = vld [vmem:[#allocation8 + $0x14] ss:$8 sps:$4 sm:$0xff]   ;;  %2287 = vmatpush1.bf16.msra.mxu1 %v3681_v28  ;;  %v3693_v28 = vld [vmem:[#allocation8 + $0x40] ss:$8 sps:$4 sm:$0xff]  }
 0x227   : > { %v4602_v36 = vld [vmem:[%s4847_s6] ss:$0 sm:$0xff]  ;;  %2288 = vmatprep.subr.bf16.mxu1 %v3686_v34 }
 0x228   : > { %v1713_v62 = vmax.f32 %v1697_v60, 0.0  ;;  %v1735_v63 = vmul.f32 %v4512_v7, %v1712_v58 }
 0x22a   : > { %1761 = vadd.xlane.f32.xlu0 %v1735_v63  ;;  %v1736_v0 = vmul.f32 %v4512_v7, %v1713_v62 }
 0x22b   : > { %v1466_v1 = vpop.f32.mrb[24].mxu0 }
 0x22c   : > { %v1698_v4 = vadd.f32 %v4504_v3, %v1466_v1  ;;  %1763 = vadd.xlane.f32.xlu1 %v1736_v0  ;;  %v4560_v56 = vpop.f32.mrb[25].mxu0 }
 0x22d   : > { %v1470_v5 = vpop.f32.mrb[26].mxu0 }
 0x22e   : > { %v1714_v8 = vmax.f32 %v1698_v4, 0.0  ;;  %v1699_v10 = vadd.f32 %v4504_v3, %v1470_v5  ;;  %v4563_v6 = vpop.f32.mrb[27].mxu0 }
 0x230   : > { %v1715_v12 = vmax.f32 %v1699_v10, 0.0  ;;  %v1737_v9 = vmul.f32 %v4512_v7, %v1714_v8 }
 0x232   : > { %1765 = vadd.xlane.f32.xlu0 %v1737_v9  ;;  %v1738_v13 = vmul.f32 %v4512_v7, %v1715_v12 }
 0x233   : > { %v1476_v15 = vpop.f32.mrb[28].mxu0 }
 0x234   : > { %v1700_v16 = vadd.f32 %v4504_v3, %v1476_v15  ;;  %1767 = vadd.xlane.f32.xlu1 %v1738_v13  ;;  %v4568_v17 = vpop.f32.mrb[29].mxu0 }
 0x235   : > { %v1480_v18 = vpop.f32.mrb[30].mxu0 }
 0x236   : > { %v1716_v20 = vmax.f32 %v1700_v16, 0.0  ;;  %v1701_v21 = vadd.f32 %v4504_v3, %v1480_v18  ;;  %v4571_v22 = vpop.f32.mrb[31].mxu0  ;;  %v3212_v3 = vpop.f32.mrb[10].mxu1 }
 0x237   : > { %v3213_v40 = vpop.f32.mrb[11].mxu1 }
 0x238   : > { %v1717_v23 = vmax.f32 %v1701_v21, 0.0  ;;  %v1739_v25 = vmul.f32 %v4512_v7, %v1716_v20  ;;  %v3215_v42 = vpop.f32.mrb[12].mxu1  ;;  %v4577_v60 = vadd.f32 %v3213_v40, %v3212_v3  ;;  %v3684_v40 = vld [vmem:[#allocation8 + $0x10] ss:$8 sps:$4 sm:$0xff]  }
 0x239   : > { %v3216_v43 = vpop.f32.mrb[13].mxu1  ;;  %2289 = vmatpush1.bf16.msra.mxu1 %v3684_v40  ;;  %v3701_v40 = vld [vmem:[#allocation8 + $0x64] ss:$8 sps:$4 sm:$0xff]  }
 0x23a   : > { %1769 = vadd.xlane.f32.xlu0 %v1739_v25  ;;  %v1740_v26 = vmul.f32 %v4512_v7, %v1717_v23  ;;  %v3218_v45 = vpop.f32.mrb[14].mxu1  ;;  %v4579_v62 = vadd.f32 %v3216_v43, %v3215_v42  ;;  %v3689_v42 = vld [vmem:[#allocation8 + $0x24] ss:$8 sps:$4 sm:$0xff]  }
 0x23b   : > { %v3219_v46 = vpop.f32.mrb[15].mxu1  ;;  %2290 = vmatprep.subr.bf16.mxu1 %v3689_v42 }
 0x23c   : > { %1771 = vadd.xlane.f32.xlu1 %v1740_v26  ;;  %v3221_v48 = vpop.f32.mrb[16].mxu1  ;;  %v4581_v63 = vadd.f32 %v3219_v46, %v3218_v45 }
 0x23d   : > { %v3222_v49 = vpop.f32.mrb[17].mxu1 }
 0x23e   : > { %v3224_v7 = vpop.f32.mrb[18].mxu1  ;;  %v4583_v0 = vadd.f32 %v3222_v49, %v3221_v48 }
 0x23f   : > { %v3225_v52 = vpop.f32.mrb[19].mxu1 }
 0x240   : > { %v3227_v53 = vpop.f32.mrb[20].mxu1  ;;  %v4585_v2 = vadd.f32 %v3225_v52, %v3224_v7  ;;  %v3687_v7 = vld [vmem:[#allocation8 + $0x20] ss:$8 sps:$4 sm:$0xff]  }
 0x241   : > { %v3228_v58 = vpop.f32.mrb[21].mxu1  ;;  %2291 = vmatpush1.bf16.msra.mxu1 %v3687_v7 }
 0x242   : > { %v3230_v1 = vpop.f32.mrb[22].mxu1  ;;  %v4587_v4 = vadd.f32 %v3228_v58, %v3227_v53  ;;  %v3692_v53 = vld [vmem:[#allocation8 + $0x34] ss:$8 sps:$4 sm:$0xff]  }
 0x243   : > { %v3231_v5 = vpop.f32.mrb[23].mxu1  ;;  %2292 = vmatprep.subr.bf16.mxu1 %v3692_v53 }
 0x244   : > { %v4589_v8 = vadd.f32 %v3231_v5, %v3230_v1  ;;  %v3233_v10 = vpop.f32.mrb[24].mxu1 }
 0x245   : > { %v3234_v12 = vpop.f32.mrb[25].mxu1 }
 0x246   : > { %v4591_v9 = vadd.f32 %v3234_v12, %v3233_v10  ;;  %v3236_v13 = vpop.f32.mrb[26].mxu1 }
 0x247   : > { %v3237_v15 = vpop.f32.mrb[27].mxu1 }
 0x248   : > { %v4593_v16 = vadd.f32 %v3237_v15, %v3236_v13  ;;  %v3239_v18 = vpop.f32.mrb[28].mxu1  ;;  %v3690_v15 = vld [vmem:[#allocation8 + $0x30] ss:$8 sps:$4 sm:$0xff]  }
 0x249   : > { %v3240_v20 = vpop.f32.mrb[29].mxu1  ;;  %2293 = vmatpush1.bf16.msra.mxu1 %v3690_v15 }
 0x24a   : > { %v4595_v21 = vadd.f32 %v3240_v20, %v3239_v18  ;;  %v3242_v23 = vpop.f32.mrb[30].mxu1 }
 0x24b   : > { %v3243_v25 = vpop.f32.mrb[31].mxu1 }
 0x24c   : > { %v4597_v26 = vadd.f32 %v3243_v25, %v3242_v23  ;;  %v3261_v27 = vpop.f32.mrb[32].mxu1 }
 0x24d   : > { %v3262_v30 = vpop.f32.mrb[33].mxu1 }
 0x24e   : > { %v3263_v32 = vadd.f32 %v3262_v30, %v3261_v27  ;;  %v3264_v33 = vpop.f32.mrb[34].mxu1 }
 0x24f   : > { %v3265_v37 = vpop.f32.mrb[35].mxu1 }
 0x250   : > { %v1617_v38 = vadd.f32 %v3263_v32, %v3199_v50  ;;  %v3266_v3 = vadd.f32 %v3265_v37, %v3264_v33  ;;  %v3267_v49 = vpop.f32.mrb[36].mxu1 }
 0x251   : > { %v3268_v52 = vpop.f32.mrb[37].mxu1 }
 0x252   : > { %v2034_v43 = vadd.f32 %v4602_v36, %v1617_v38  ;;  %v1620_v45 = vadd.f32 %v3266_v3, %v3202_v54  ;;  %v3269_v1 = vadd.f32 %v3268_v52, %v3267_v49  ;;  %v3270_v50 = vpop.f32.mrb[38].mxu1  ;;  %v3695_v54 = vld [vmem:[#allocation8 + $0x44] ss:$8 sps:$4 sm:$0xff]   ;;  %v3696_v3 = vld [vmem:[#allocation8 + $0x50] ss:$8 sps:$4 sm:$0xff]  }
 0x253   : > { %v3271_v5 = vpop.f32.mrb[39].mxu1  ;;  %2294 = vmatprep.subr.bf16.mxu1 %v3695_v54  ;;  %v3699_v49 = vld [vmem:[#allocation8 + $0x60] ss:$8 sps:$4 sm:$0xff]  }
 0x254   : > { %v2050_v46 = vmax.f32 %v2034_v43, 0.0  ;;  %v2035_v48 = vadd.f32 %v4602_v36, %v1620_v45  ;;  %v1625_v10 = vadd.f32 %v3269_v1, %v3205_v55  ;;  %v3272_v12 = vadd.f32 %v3271_v5, %v3270_v50  ;;  %v3273_v27 = vpop.f32.mrb[40].mxu1  ;;  %2295 = vmatpush1.bf16.msra.mxu1 %v3693_v28 }
 0x255   : > { %v3274_v30 = vpop.f32.mrb[41].mxu1  ;;  %2296 = vmatprep.subr.bf16.mxu1 %v3698_v31 }
 0x256   : > { %v2051_v58 = vmax.f32 %v2035_v48, 0.0  ;;  %v2036_v18 = vadd.f32 %v4602_v36, %v1625_v10  ;;  %v1628_v20 = vadd.f32 %v3272_v12, %v3208_v41  ;;  %v3275_v32 = vadd.f32 %v3274_v30, %v3273_v27  ;;  %v3276_v33 = vpop.f32.mrb[42].mxu1  ;;  %v3702_v10 = vld [vmem:[#allocation8 + $0x70] ss:$8 sps:$4 sm:$0xff]  }
 0x257   : > { %v3277_v34 = vpop.f32.mrb[43].mxu1 }
 0x258   : > { %v2067_v13 = vpack.c.bf16 %v2051_v58, %v2050_v46  ;;  %v2052_v23 = vmax.f32 %v2036_v18, 0.0  ;;  %v2037_v25 = vadd.f32 %v4602_v36, %v1628_v20  ;;  %v1633_v37 = vadd.f32 %v3275_v32, %v4575_v44  ;;  %v3279_v48 = vpop.f32.mrb[44].mxu1  ;;  %2297 = vmatpush1.bf16.msra.mxu1 %v3696_v3  ;;  %v3704_v44 = vld [vmem:[#allocation8 + $0x74] ss:$8 sps:$4 sm:$0xff]  }
 0x259   : > { %v3278_v38 = vadd.f32 %v3277_v34, %v3276_v33  ;;  %v3280_v7 = vpop.f32.mrb[45].mxu1  ;;  %2298 = vmatprep.subr.bf16.mxu1 %v3701_v40  ;;  %v3708_v33 = vld [vmem:[#allocation8 + $0x90] ss:$8 sps:$4 sm:$0xff]   ;;  %v4625_v3 = vld [vmem:[#allocation2] ss:$0 sm:$0xff] }
 0x25a   : > { %2318 = vmatprep.mubr.bf16.mxu1 %v2067_v13  ;;  %v2053_v55 = vmax.f32 %v2037_v25, 0.0  ;;  %v2038_v42 = vadd.f32 %v4602_v36, %v1633_v37  ;;  %v3281_v53 = vadd.f32 %v3280_v7, %v3279_v48  ;;  %v3282_v58 = vpop.f32.mrb[46].mxu1  ;;  %v3716_v48 = vld [vmem:[#allocation8 + $0xb4] ss:$8 sps:$4 sm:$0xff]  }
 0x25b   : > { %v1636_v43 = vadd.f32 %v3278_v38, %v4577_v60  ;;  %v3283_v1 = vpop.f32.mrb[47].mxu1  ;;  %v3707_v60 = vld [vmem:[#allocation8 + $0x84] ss:$8 sps:$4 sm:$0xff]  }
 0x25c   : > { %v4609_v41 = vpack.c.bf16 %v2053_v55, %v2052_v23  ;;  %v2054_v45 = vmax.f32 %v2038_v42, 0.0  ;;  %v1641_v50 = vadd.f32 %v3281_v53, %v4579_v62  ;;  %v3284_v5 = vadd.f32 %v3283_v1, %v3282_v58  ;;  %2299 = vmatpush1.bf16.msra.mxu1 %v3699_v49  ;;  %v3285_v20 = vpop.f32.mrb[48].mxu1  ;;  %v3705_v23 = vld [vmem:[#allocation8 + $0x80] ss:$8 sps:$4 sm:$0xff]   ;;  %v3710_v62 = vld [vmem:[#allocation8 + $0x94] ss:$8 sps:$4 sm:$0xff]  }
 0x25d   : > { %v2039_v46 = vadd.f32 %v4602_v36, %v1636_v43  ;;  %2300 = vmatprep.subr.bf16.mxu1 %v3704_v44  ;;  %v3286_v25 = vpop.f32.mrb[49].mxu1 }
 0x25e   : > { %v2040_v13 = vadd.f32 %v4602_v36, %v1641_v50  ;;  %v1644_v15 = vadd.f32 %v3284_v5, %v4581_v63  ;;  %v3287_v28 = vadd.f32 %v3286_v25, %v3285_v20  ;;  %v3288_v30 = vpop.f32.mrb[50].mxu1  ;;  %v3713_v63 = vld [vmem:[#allocation8 + $0xa4] ss:$8 sps:$4 sm:$0xff]   ;;  %v3714_v50 = vld [vmem:[#allocation8 + $0xb0] ss:$8 sps:$4 sm:$0xff]  }
 0x25f   : > { %v2055_v52 = vmax.f32 %v2039_v46, 0.0  ;;  %v3289_v31 = vpop.f32.mrb[51].mxu1  ;;  %v3717_v25 = vld [vmem:[#allocation8 + $0xc0] ss:$8 sps:$4 sm:$0xff]  }
 0x260   : > { %v2056_v54 = vmax.f32 %v2040_v13, 0.0  ;;  %v2041_v18 = vadd.f32 %v4602_v36, %v1644_v15  ;;  %2301 = vmatpush1.bf16.msra.mxu1 %v3702_v10  ;;  %v1649_v55 = vadd.f32 %v3287_v28, %v4583_v0  ;;  %v3290_v32 = vadd.f32 %v3289_v31, %v3288_v30  ;;  %v3291_v43 = vpop.f32.mrb[52].mxu1 }
 0x261   : > { %v4615_v12 = vpack.c.bf16 %v2055_v52, %v2054_v45  ;;  %2302 = vmatprep.subr.bf16.mxu1 %v3707_v60  ;;  %v3711_v45 = vld [vmem:[#allocation8 + $0xa0] ss:$8 sps:$4 sm:$0xff]   ;;  %v3292_v46 = vpop.f32.mrb[53].mxu1  ;;  %v3719_v60 = vld [vmem:[#allocation8 + $0xc4] ss:$8 sps:$4 sm:$0xff]  }
 0x262   : > { %v2057_v27 = vmax.f32 %v2041_v18, 0.0  ;;  %v2042_v37 = vadd.f32 %v4602_v36, %v1649_v55  ;;  %v1652_v38 = vadd.f32 %v3290_v32, %v4585_v2  ;;  %v3293_v44 = vadd.f32 %v3292_v46, %v3291_v43  ;;  %v3294_v52 = vpop.f32.mrb[54].mxu1 }
 0x263   : > { %v3295_v53 = vpop.f32.mrb[55].mxu1 }
 0x264   : > { %2303 = vmatpush1.bf16.msra.mxu1 %v3705_v23  ;;  %v4621_v34 = vpack.c.bf16 %v2057_v27, %v2056_v54  ;;  %v2058_v40 = vmax.f32 %v2042_v37, 0.0  ;;  %v2043_v42 = vadd.f32 %v4602_v36, %v1652_v38  ;;  %v1657_v2 = vadd.f32 %v3293_v44, %v4587_v4  ;;  %v3297_v4 = vpop.f32.mrb[56].mxu1 }
 0x265   : > { %2304 = vmatprep.subr.bf16.mxu1 %v3710_v62  ;;  %v3296_v1 = vadd.f32 %v3295_v53, %v3294_v52  ;;  %v3298_v27 = vpop.f32.mrb[57].mxu1 }
 0x266   : > { %v2059_v7 = vmax.f32 %v2043_v42, 0.0  ;;  %v2044_v15 = vadd.f32 %v4602_v36, %v1657_v2  ;;  %v3299_v31 = vadd.f32 %v3298_v27, %v3297_v4  ;;  %v3300_v55 = vpop.f32.mrb[58].mxu1 }
 0x267   : > { %v1660_v54 = vadd.f32 %v3296_v1, %v4589_v8  ;;  %v3301_v32 = vpop.f32.mrb[59].mxu1 }
 0x268   : > { %2305 = vmatpush1.bf16.msra.mxu1 %v3708_v33  ;;  %v4630_v5 = vpack.c.bf16 %v2059_v7, %v2058_v40  ;;  %v2060_v20 = vmax.f32 %v2044_v15, 0.0  ;;  %v1665_v8 = vadd.f32 %v3299_v31, %v4591_v9 }
 0x269   : > { %2306 = vmatprep.subr.bf16.mxu1 %v3713_v63  ;;  %v2045_v23 = vadd.f32 %v4602_v36, %v1660_v54  ;;  %v3302_v63 = vadd.f32 %v3301_v32, %v3300_v55 }
 0x26a   : > { %v2046_v42 = vadd.f32 %v4602_v36, %v1665_v8 }
 0x26b   : > { %v2061_v30 = vmax.f32 %v2045_v23, 0.0  ;;  %v1668_v43 = vadd.f32 %v3302_v63, %v4593_v16  ;;  %v3722_v63 = vld [vmem:[#allocation8 + $0xd4] ss:$8 sps:$4 sm:$0xff]  }
 0x26c   : > { %2307 = vmatpush1.bf16.msra.mxu1 %v3711_v45  ;;  %v2062_v9 = vmax.f32 %v2046_v42, 0.0  ;;  %v3720_v42 = vld [vmem:[#allocation8 + $0xd0] ss:$8 sps:$4 sm:$0xff]  }
 0x26d   : > { %2308 = vmatprep.subr.bf16.mxu1 %v3716_v48  ;;  %v4638_v37 = vpack.c.bf16 %v2061_v30, %v2060_v20  ;;  %v2047_v46 = vadd.f32 %v4602_v36, %v1668_v43  ;;  %v3303_v48 = vpop.f32.mrb[60].mxu1 }
 0x26e   : > { %v3304_v44 = vpop.f32.mrb[61].mxu1 }
 0x26f   : > { %v2063_v53 = vmax.f32 %v2047_v46, 0.0  ;;  %v3306_v2 = vpop.f32.mrb[62].mxu1 }
 0x270   : > { %2309 = vmatpush1.bf16.msra.mxu1 %v3714_v50  ;;  %v3307_v50 = vpop.f32.mrb[63].mxu1 }
 0x271   : > { %2310 = vmatprep.subr.bf16.mxu1 %v3719_v60  ;;  %v3308_v15 = vadd.f32 %v3307_v50, %v3306_v2  ;;  %v3728_v2 = vld [vmem:[#allocation8 + $0xf4] ss:$8 sps:$4 sm:$0xff]   ;;  %v3726_v50 = vld [vmem:[#allocation8 + $0xf0] ss:$8 sps:$4 sm:$0xff]  }
 0x273   : > { %v1676_v4 = vadd.f32 %v3308_v15, %v4597_v26 }
 0x274   : > { %2311 = vmatpush1.bf16.msra.mxu1 %v3717_v25 }
 0x275   : > { %v2049_v27 = vadd.f32 %v4602_v36, %v1676_v4  ;;  %2312 = vmatprep.subr.bf16.mxu1 %v3722_v63 }
 0x277   : > { %v2065_v31 = vmax.f32 %v2049_v27, 0.0 }
 0x278   : > { %2313 = vmatpush1.bf16.msra.mxu1 %v3720_v42 }
 0x28f   : > { %v1742_v0 = vpop.xlane.xlu0 %1741 }
 0x290   : > { %v1780_v49 = vadd.f32 %v4625_v3, %v1742_v0 }
 0x292   : > { %v3097_v58 = vmul.f32 -1.442695, %v1780_v49 }
 0x293   : > { %v1744_v10 = vpop.xlane.xlu0 %1743 }
 0x294   : > { %3753 = vpow2.f32 %v3097_v58  ;;  %v1781_v13 = vadd.f32 %v4625_v3, %v1744_v10  ;;  %v3305_v58 = vadd.f32 %v3304_v44, %v3303_v48 }
 0x296   : > { %v3098_v18 = vmul.f32 -1.442695, %v1781_v13  ;;  %v1673_v13 = vadd.f32 %v3305_v58, %v4595_v21 }
 0x297   : > { %v1746_v62 = vpop.xlane.xlu1 %1745 }
 0x298   : > { %3755 = vpow2.f32 %v3098_v18  ;;  %v1782_v28 = vadd.f32 %v4625_v3, %v1746_v62  ;;  %v4647_v18 = vpack.c.bf16 %v2063_v53, %v2062_v9  ;;  %v2048_v23 = vadd.f32 %v4602_v36, %v1673_v13 }
 0x29a   : > { %v3099_v33 = vmul.f32 -1.442695, %v1782_v28  ;;  %v2064_v62 = vmax.f32 %v2048_v23, 0.0 }
 0x29b   : > { %v1748_v38 = vpop.xlane.xlu1 %1747 }
 0x29c   : > { %3757 = vpow2.f32 %v3099_v33  ;;  %v1783_v40 = vadd.f32 %v4625_v3, %v1748_v38  ;;  %v4654_v38 = vpack.c.bf16 %v2065_v31, %v2064_v62 }
 0x29e   : > { %v3754_v45 = vpop.eup %3753  ;;  %v3100_v0 = vmul.f32 -1.442695, %v1783_v40 }
 0x29f   : > { %v1844_v49 = vadd.f32 1.0, %v3754_v45  ;;  %v1750_v7 = vpop.xlane.xlu0 %1749  ;;  %v3725_v45 = vld [vmem:[#allocation8 + $0xe4] ss:$8 sps:$4 sm:$0xff]  }
 0x2a0   : > { %3759 = vpow2.f32 %v3100_v0  ;;  %v1784_v52 = vadd.f32 %v4625_v3, %v1750_v7  ;;  %2314 = vmatprep.subr.bf16.mxu1 %v3725_v45 }
 0x2a1   : > { %3761 = vrcp.f32 %v1844_v49  ;;  %v1752_v1 = vpop.xlane.xlu1 %1751  ;;  %v3723_v49 = vld [vmem:[#allocation8 + $0xe0] ss:$8 sps:$4 sm:$0xff]  }
 0x2a2   : > { %v3756_v10 = vpop.eup %3755  ;;  %v3101_v16 = vmul.f32 -1.442695, %v1784_v52  ;;  %v1785_v60 = vadd.f32 %v4625_v3, %v1752_v1  ;;  %2315 = vmatpush1.bf16.msra.mxu1 %v3723_v49 }
 0x2a3   : > { %v1845_v54 = vadd.f32 1.0, %v3756_v10  ;;  %2316 = vmatprep.subr.bf16.mxu1 %v3728_v2 }
 0x2a4   : > { %3763 = vpow2.f32 %v3101_v16  ;;  %v3102_v20 = vmul.f32 -1.442695, %v1785_v60 }
 0x2a5   : > { %3765 = vrcp.f32 %v1845_v54 }
 0x2a6   : > { %v3758_v25 = vpop.eup %3757  ;;  %3767 = vpow2.f32 %v3102_v20  ;;  %2317 = vmatpush1.bf16.msra.mxu1 %v3726_v50 }
 0x2a7   : > { %v1846_v28 = vadd.f32 1.0, %v3758_v25  ;;  %v1754_v30 = vpop.xlane.xlu0 %1753 }
 0x2a8   : > { %v1786_v21 = vadd.f32 %v4625_v3, %v1754_v30 }
 0x2a9   : > { %3769 = vrcp.f32 %v1846_v28  ;;  %v1756_v55 = vpop.xlane.xlu1 %1755 }
 0x2aa   : > { %v3760_v32 = vpop.eup %3759  ;;  %v3103_v33 = vmul.f32 -1.442695, %v1786_v21  ;;  %v1787_v8 = vadd.f32 %v4625_v3, %v1756_v55 }
 0x2ab   : > { %v3762_v26 = vpop.eup %3761  ;;  %v1847_v40 = vadd.f32 1.0, %v3760_v32 }
 0x2ac   : > { %3771 = vpow2.f32 %v3103_v33  ;;  %v3104_v43 = vmul.f32 -1.442695, %v1787_v8  ;;  %1894 = vperm.xlu0 %3551, %v3762_v26  }
 0x2ad   : > { %3773 = vrcp.f32 %v1847_v40 }
 0x2ae   : > { %v3764_v36 = vpop.eup %3763  ;;  %3775 = vpow2.f32 %v3104_v43 }
 0x2af   : > { %v3766_v0 = vpop.eup %3765  ;;  %v1848_v46 = vadd.f32 1.0, %v3764_v36  ;;  %v1758_v48 = vpop.xlane.xlu0 %1757 }
 0x2b0   : > { %v3768_v7 = vpop.eup %3767  ;;  %v1788_v9 = vadd.f32 %v4625_v3, %v1758_v48  ;;  %1899 = vperm.xlu1 %3552, %v3766_v0  }
 0x2b1   : > { %3777 = vrcp.f32 %v1848_v46  ;;  %v1849_v44 = vadd.f32 1.0, %v3768_v7  ;;  %v1760_v52 = vpop.xlane.xlu1 %1759 }
 0x2b2   : > { %v3105_v53 = vmul.f32 -1.442695, %v1788_v9  ;;  %v1789_v58 = vadd.f32 %v4625_v3, %v1760_v52 }
 0x2b3   : > { %v3770_v1 = vpop.eup %3769 }
 0x2b4   : > { %3779 = vpow2.f32 %v3105_v53  ;;  %v3106_v10 = vmul.f32 -1.442695, %v1789_v58  ;;  %1904 = vperm.xlu1 %3552, %v3770_v1  }
 0x2b5   : > { %3781 = vrcp.f32 %v1849_v44 }
 0x2b6   : > { %v3772_v16 = vpop.eup %3771  ;;  %3783 = vpow2.f32 %v3106_v10 }
 0x2b7   : > { %v3774_v60 = vpop.eup %3773  ;;  %v1850_v13 = vadd.f32 1.0, %v3772_v16  ;;  %v1762_v15 = vpop.xlane.xlu0 %1761 }
 0x2b8   : > { %v3776_v54 = vpop.eup %3775  ;;  %v1790_v20 = vadd.f32 %v4625_v3, %v1762_v15  ;;  %1909 = vperm.xlu1 %3552, %v3774_v60  }
 0x2b9   : > { %3785 = vrcp.f32 %v1850_v13  ;;  %v1851_v23 = vadd.f32 1.0, %v3776_v54  ;;  %v1764_v4 = vpop.xlane.xlu1 %1763 }
 0x2ba   : > { %v3107_v25 = vmul.f32 -1.442695, %v1790_v20  ;;  %v1791_v62 = vadd.f32 %v4625_v3, %v1764_v4 }
 0x2bb   : > { %v3778_v27 = vpop.eup %3777 }
 0x2bc   : > { %3787 = vpow2.f32 %v3107_v25  ;;  %v3108_v28 = vmul.f32 -1.442695, %v1791_v62  ;;  %1914 = vperm.xlu1 %3552, %v3778_v27   ;;  %v3729_v27 = vld [vmem:[#allocation9 + $0x40] sm:$0xff]  }
 0x2bd   : > { %3789 = vrcp.f32 %v1851_v23  ;;  %3309 = vmatprep.subr.bf16.mxu0 %v3729_v27 }
 0x2be   : > { %v3780_v30 = vpop.eup %3779  ;;  %3791 = vpow2.f32 %v3108_v28  ;;  %v3730_v28 = vld [vmem:[#allocation9] sm:$0xff]  }
 0x2bf   : > { %v3782_v21 = vpop.eup %3781  ;;  %v1852_v31 = vadd.f32 1.0, %v3780_v30  ;;  %v1766_v55 = vpop.xlane.xlu0 %1765  ;;  %v3731_v30 = vld [vmem:[#allocation9 + $0x48] sm:$0xff]   ;;  %3310 = vmatpush3.bf16.msra.mxu0 %v3730_v28 }
 0x2c0   : > { %v3784_v32 = vpop.eup %3783  ;;  %v1792_v33 = vadd.f32 %v4625_v3, %v1766_v55  ;;  %1919 = vperm.xlu1 %3552, %v3782_v21   ;;  %v3732_v21 = vld [vmem:[#allocation9 + $0x8] sm:$0xff]   ;;  %3311 = vmatprep.subr.bf16.mxu0 %v3731_v30  ;;  %v3734_v55 = vld [vmem:[#allocation9 + $0x10] sm:$0xff]  }
 0x2c1   : > { %3793 = vrcp.f32 %v1852_v31  ;;  %v1853_v8 = vadd.f32 1.0, %v3784_v32  ;;  %v1768_v63 = vpop.xlane.xlu1 %1767  ;;  %v3733_v31 = vld [vmem:[#allocation9 + $0x50] sm:$0xff]   ;;  %v3735_v32 = vld [vmem:[#allocation9 + $0x58] sm:$0xff]  }
 0x2c2   : > { %v3109_v26 = vmul.f32 -1.442695, %v1792_v33  ;;  %v1793_v40 = vadd.f32 %v4625_v3, %v1768_v63  ;;  %v3736_v33 = vld [vmem:[#allocation9 + $0x18] sm:$0xff]   ;;  %v3738_v63 = vld [vmem:[#allocation9 + $0x20] sm:$0xff]  }
 0x2c3   : > { %v3786_v42 = vpop.eup %3785  ;;  %3795 = vrcp.f32 %v1853_v8  ;;  %3312 = vmatpush3.bf16.msra.mxu0 %v3732_v21  ;;  %v3737_v8 = vld [vmem:[#allocation9 + $0x60] sm:$0xff]  }
 0x2c4   : > { %3797 = vpow2.f32 %v3109_v26  ;;  %v3110_v43 = vmul.f32 -1.442695, %v1793_v40  ;;  %1924 = vperm.xlu1 %3552, %v3786_v42   ;;  %3313 = vmatprep.subr.bf16.mxu0 %v3733_v31  ;;  %v3739_v26 = vld [vmem:[#allocation9 + $0x68] sm:$0xff]   ;;  %v3741_v42 = vld [vmem:[#allocation9 + $0x70] sm:$0xff]  }
 0x2c5   : > { %v3740_v40 = vld [vmem:[#allocation9 + $0x28] sm:$0xff]  }
 0x2c6   : > { %v3788_v36 = vpop.eup %3787  ;;  %3799 = vpow2.f32 %v3110_v43  ;;  %v3742_v43 = vld [vmem:[#allocation9 + $0x30] sm:$0xff]  }
 0x2c7   : > { %v3790_v45 = vpop.eup %3789  ;;  %v1854_v0 = vadd.f32 1.0, %v3788_v36  ;;  %v1770_v46 = vpop.xlane.xlu0 %1769  ;;  %3314 = vmatpush3.bf16.msra.mxu0 %v3734_v55 }
 0x2c8   : > { %v3792_v48 = vpop.eup %3791  ;;  %v1794_v49 = vadd.f32 %v4625_v3, %v1770_v46  ;;  %1929 = vperm.xlu1 %3552, %v3790_v45   ;;  %3315 = vmatprep.subr.bf16.mxu0 %v3735_v32 }
 0x2c9   : > { %3801 = vrcp.f32 %v1854_v0  ;;  %v1855_v7 = vadd.f32 1.0, %v3792_v48  ;;  %v1772_v9 = vpop.xlane.xlu1 %1771  ;;  %v4668_v0 = vld [vmem:[%s4846_s5] ss:$0 sm:$0xff] }
 0x2ca   : > { %v3111_v44 = vmul.f32 -1.442695, %v1794_v49  ;;  %v1795_v52 = vadd.f32 %v4625_v3, %v1772_v9 }
 0x2cb   : > { %v3794_v53 = vpop.eup %3793  ;;  %3803 = vrcp.f32 %v1855_v7  ;;  %3316 = vmatpush3.bf16.msra.mxu0 %v3736_v33 }
 0x2cc   : > { %3805 = vpow2.f32 %v3111_v44  ;;  %v3112_v58 = vmul.f32 -1.442695, %v1795_v52  ;;  %1934 = vperm.xlu1 %3552, %v3794_v53   ;;  %3317 = vmatprep.subr.bf16.mxu0 %v3737_v8 }
 0x2cd   : > { %v3796_v2 = vpop.eup %3795 }
 0x2ce   : > { %v3798_v1 = vpop.eup %3797  ;;  %3807 = vpow2.f32 %v3112_v58  ;;  %1939 = vperm.xlu0 %3551, %v3796_v2  }
 0x2cf   : > { %v1856_v50 = vadd.f32 1.0, %v3798_v1  ;;  %3318 = vmatpush3.bf16.msra.mxu0 %v3738_v63 }
 0x2d0   : > { %v3800_v10 = vpop.eup %3799  ;;  %3319 = vmatprep.subr.bf16.mxu0 %v3739_v26 }
 0x2d1   : > { %3809 = vrcp.f32 %v1856_v50  ;;  %v1857_v16 = vadd.f32 1.0, %v3800_v10 }
 0x2d3   : > { %v3802_v60 = vpop.eup %3801  ;;  %3811 = vrcp.f32 %v1857_v16  ;;  %3320 = vmatpush3.bf16.msra.mxu0 %v3740_v40 }
 0x2d4   : > { %1944 = vperm.xlu1 %3552, %v3802_v60   ;;  %3321 = vmatprep.subr.bf16.mxu0 %v3741_v42 }
 0x2d5   : > { %v3804_v13 = vpop.eup %3803 }
 0x2d6   : > { %v3806_v15 = vpop.eup %3805  ;;  %1949 = vperm.xlu0 %3551, %v3804_v13  }
 0x2d7   : > { %v1858_v3 = vadd.f32 1.0, %v3806_v15  ;;  %3322 = vmatpush3.bf16.msra.mxu0 %v3742_v43 }
 0x2d8   : > { %v3808_v54 = vpop.eup %3807 }
 0x2d9   : > { %3813 = vrcp.f32 %v1858_v3  ;;  %v1859_v20 = vadd.f32 1.0, %v3808_v54 }
 0x2db   : > { %v3810_v23 = vpop.eup %3809  ;;  %3815 = vrcp.f32 %v1859_v20 }
 0x2dc   : > { %1954 = vperm.xlu1 %3552, %v3810_v23  }
 0x2dd   : > { %v3812_v4 = vpop.eup %3811 }
 0x2de   : > { %1959 = vperm.xlu0 %3551, %v3812_v4  }
 0x2e3   : > { %v3814_v25 = vpop.eup %3813 }
 0x2e4   : > { %1964 = vperm.xlu1 %3552, %v3814_v25  }
 0x2e5   : > { %v3816_v62 = vpop.eup %3815 }
 0x2e6   : > { %1969 = vperm.xlu0 %3551, %v3816_v62  }
 0x32b   : > { %v1895_v36 = vpop.permute.xlu0 %1894 }
 0x32c   : > { %v1972_v45 = vmul.f32 %v1895_v36, %v4507_v59 }
 0x32e   : > { %v1995_v48 = vadd.f32 %v4668_v0, %v1972_v45 }
 0x32f   : > { %v1900_v46 = vpop.permute.xlu1 %1899 }
 0x330   : > { %v1973_v49 = vmul.f32 %v1900_v46, %v4515_v11  ;;  %v2011_v44 = vmax.f32 %v1995_v48, 0.0 }
 0x332   : > { %v1996_v7 = vadd.f32 %v4668_v0, %v1973_v49 }
 0x333   : > { %v1905_v9 = vpop.permute.xlu1 %1904 }
 0x334   : > { %v2012_v52 = vmax.f32 %v1996_v7, 0.0  ;;  %v1974_v53 = vmul.f32 %v1905_v9, %v4519_v14 }
 0x336   : > { %v2066_v58 = vpack.c.bf16 %v2012_v52, %v2011_v44  ;;  %v1997_v59 = vadd.f32 %v4668_v0, %v1974_v53 }
 0x337   : > { %v1910_v2 = vpop.permute.xlu1 %1909 }
 0x338   : > { %v1975_v1 = vmul.f32 %v1910_v2, %v4523_v19  ;;  %2319 = vmatmul.mubr.bf16.vlgmr.msra.gmra.mrb[64].mxu1 %v2066_v58  ;;  %v2013_v11 = vmax.f32 %v1997_v59, 0.0 }
 0x339   : > { %2328 = vmatprep.mubr.bf16.mxu1 %v4609_v41 }
 0x33a   : > { %v1998_v50 = vadd.f32 %v4668_v0, %v1975_v1  ;;  %v3744_v1 = vld [vmem:[#allocation9 + $0x38] sm:$0xff]  }
 0x33b   : > { %v1915_v10 = vpop.permute.xlu1 %1914 }
 0x33c   : > { %v2014_v16 = vmax.f32 %v1998_v50, 0.0  ;;  %v1976_v60 = vmul.f32 %v1915_v10, %v4527_v24  ;;  %v3746_v50 = vld [vmem:[#allocation11 + $0x8] sm:$0xff]   ;;  %v3747_v10 = vld [vmem:[#allocation11 + $0x10] sm:$0xff]  }
 0x33e   : > { %v2068_v13 = vpack.c.bf16 %v2014_v16, %v2013_v11  ;;  %v1999_v14 = vadd.f32 %v4668_v0, %v1976_v60  ;;  %v2114_v11 = vld [vmem:[%s4849_s8] sm:$0x3] }
 0x33f   : > { %v1920_v15 = vpop.permute.xlu1 %1919 }
 0x340   : > { %v1977_v3 = vmul.f32 %v1920_v15, %v4531_v29  ;;  %2329 = vmatmul.mubr.bf16.gmra.mrb[68].mxu1 %v2068_v13  ;;  %v2015_v41 = vmax.f32 %v1999_v14, 0.0 }
 0x341   : > { %2338 = vmatprep.mubr.bf16.mxu1 %v4615_v12 }
 0x342   : > { %v2000_v19 = vadd.f32 %v4668_v0, %v1977_v3 }
 0x343   : > { %v1925_v54 = vpop.permute.xlu1 %1924 }
 0x344   : > { %v2016_v20 = vmax.f32 %v2000_v19, 0.0  ;;  %v1978_v23 = vmul.f32 %v1925_v54, %v4536_v35 }
 0x346   : > { %v2070_v4 = vpack.c.bf16 %v2016_v20, %v2015_v41  ;;  %v2001_v24 = vadd.f32 %v4668_v0, %v1978_v23 }
 0x347   : > { %v1930_v25 = vpop.permute.xlu1 %1929 }
 0x348   : > { %v1979_v62 = vmul.f32 %v1930_v25, %v4539_v39  ;;  %2339 = vmatmul.mubr.bf16.gmra.mrb[72].mxu1 %v2070_v4  ;;  %v2017_v12 = vmax.f32 %v2001_v24, 0.0 }
 0x349   : > { %2348 = vmatprep.mubr.bf16.mxu1 %v4621_v34 }
 0x34a   : > { %v2002_v29 = vadd.f32 %v4668_v0, %v1979_v62 }
 0x34b   : > { %v1935_v27 = vpop.permute.xlu1 %1934 }
 0x34c   : > { %v2018_v28 = vmax.f32 %v2002_v29, 0.0  ;;  %v1980_v30 = vmul.f32 %v1935_v27, %v4544_v47 }
 0x34d   : > { %v1940_v21 = vpop.permute.xlu0 %1939 }
 0x34e   : > { %v2003_v31 = vadd.f32 %v4668_v0, %v1980_v30  ;;  %v1981_v35 = vmul.f32 %v1940_v21, %v4547_v51  ;;  %v2072_v55 = vpack.c.bf16 %v2018_v28, %v2017_v12 }
 0x350   : > { %v2004_v32 = vadd.f32 %v4668_v0, %v1981_v35  ;;  %2349 = vmatmul.mubr.bf16.gmra.mrb[76].mxu1 %v2072_v55  ;;  %v2019_v39 = vmax.f32 %v2003_v31, 0.0 }
 0x351   : > { %2358 = vmatprep.mubr.bf16.mxu1 %v4630_v5 }
 0x352   : > { %v2020_v34 = vmax.f32 %v2004_v32, 0.0 }
 0x353   : > { %v1945_v33 = vpop.permute.xlu1 %1944 }
 0x354   : > { %v1982_v8 = vmul.f32 %v1945_v33, %v4552_v57  ;;  %v2074_v63 = vpack.c.bf16 %v2020_v34, %v2019_v39 }
 0x355   : > { %v1950_v26 = vpop.permute.xlu0 %1949 }
 0x356   : > { %v2005_v47 = vadd.f32 %v4668_v0, %v1982_v8  ;;  %v1983_v40 = vmul.f32 %v1950_v26, %v4555_v61 }
 0x358   : > { %v2006_v42 = vadd.f32 %v4668_v0, %v1983_v40  ;;  %2359 = vmatmul.mubr.bf16.gmra.mrb[80].mxu1 %v2074_v63  ;;  %v2021_v51 = vmax.f32 %v2005_v47, 0.0 }
 0x359   : > { %2368 = vmatprep.mubr.bf16.mxu1 %v4638_v37 }
 0x35a   : > { %v2022_v43 = vmax.f32 %v2006_v42, 0.0 }
 0x35b   : > { %v1955_v36 = vpop.permute.xlu1 %1954 }
 0x35c   : > { %v1984_v5 = vmul.f32 %v1955_v36, %v4560_v56  ;;  %v2076_v45 = vpack.c.bf16 %v2022_v43, %v2021_v51 }
 0x35d   : > { %v1960_v46 = vpop.permute.xlu0 %1959 }
 0x35e   : > { %v2007_v57 = vadd.f32 %v4668_v0, %v1984_v5  ;;  %v1985_v48 = vmul.f32 %v1960_v46, %v4563_v6 }
 0x360   : > { %v2008_v49 = vadd.f32 %v4668_v0, %v1985_v48  ;;  %2369 = vmatmul.mubr.bf16.gmra.mrb[84].mxu1 %v2076_v45  ;;  %v2023_v61 = vmax.f32 %v2007_v57, 0.0 }
 0x361   : > { %2378 = vmatprep.mubr.bf16.mxu1 %v4647_v18  ;;  %v3743_v18 = vld [vmem:[#allocation9 + $0x78] sm:$0xff]  }
 0x362   : > { %v2024_v7 = vmax.f32 %v2008_v49, 0.0  ;;  %3323 = vmatprep.subr.bf16.mxu0 %v3743_v18 }
 0x363   : > { %v1965_v9 = vpop.permute.xlu1 %1964  ;;  %3324 = vmatpush3.bf16.msra.mxu0 %v3744_v1 }
 0x364   : > { %v1986_v37 = vmul.f32 %v1965_v9, %v4568_v17  ;;  %v2078_v44 = vpack.c.bf16 %v2024_v7, %v2023_v61  ;;  %v3745_v17 = vld [vmem:[#allocation11] sm:$0xff]  }
 0x365   : > { %v1970_v52 = vpop.permute.xlu0 %1969  ;;  %3389 = vmatprep.subr.bf16.mxu1 %v3745_v17 }
 0x366   : > { %v2009_v56 = vadd.f32 %v4668_v0, %v1986_v37  ;;  %v1987_v53 = vmul.f32 %v1970_v52, %v4571_v22  ;;  %3390 = vmatpush3.bf16.msra.mxu1 %v3745_v17  ;;  %v2116_v22 = vlaneseq }
 0x367   : > { %3391 = vmatprep.subr.bf16.mxu1 %v3746_v50 }
 0x368   : > { %v2010_v58 = vadd.f32 %v4668_v0, %v1987_v53  ;;  %2379 = vmatmul.mubr.bf16.gmra.mrb[88].mxu1 %v2078_v44  ;;  %v2025_v6 = vmax.f32 %v2009_v56, 0.0  ;;  %v2117_v0 = vshrl.u32 %v2116_v22, 7 }
 0x369   : > { %2388 = vmatprep.mubr.bf16.mxu1 %v4654_v38 }
 0x36a   : > { %v2026_v2 = vmax.f32 %v2010_v58, 0.0  ;;  %3392 = vmatpush3.bf16.msra.mxu1 %v3746_v50  ;;  %v2118_v38 = vsub.s32 0, %v2117_v0  ;;  %v2122_v16 = vsub.s32 1, %v2117_v0 }
 0x36b   : > { %3393 = vmatprep.subr.bf16.mxu1 %v3747_v10 }
 0x36c   : > { %v2080_v59 = vpack.c.bf16 %v2026_v2, %v2025_v6  ;;  %v4711_v60 = vrot.slane %v2114_v11, %v2118_v38  ;;  %v4713_v15 = vrot.slane %v2114_v11, %v2122_v16 }
 0x36e   : > { %3394 = vmatpush3.bf16.msra.mxu1 %v3747_v10 }
 0x370   : > { %2389 = vmatmul.mubr.bf16.gmra.mrb[92].mxu1 %v2080_v59 }
 0x40b   : > { %v2320_v13 = vpop.f32.mrb[64].mxu1 }
 0x40c   : > { %v2322_v14 = vpop.f32.mrb[65].mxu1  ;;  %v2321_v19 = vadd.f32 %v2320_v13, %v4711_v60 }
 0x40d   : > { %v2324_v3 = vpop.f32.mrb[66].mxu1  ;;  %v2323_v20 = vadd.f32 %v2322_v14, %v4713_v15 }
 0x40e   : > { %v2325_v54 = vadd.f32 %v2324_v3, %v4711_v60  ;;  %v2326_v41 = vpop.f32.mrb[67].mxu1 }
 0x40f   : > { %v2327_v23 = vadd.f32 %v2326_v41, %v4713_v15 }
 0x410   : > { %v2399_v4 = vpack.c.bf16 %v2325_v54, %v2321_v19 }
 0x411   : > { %v2400_v25 = vpack.c.bf16 %v2327_v23, %v2323_v20 }
 0x413   : > { %v2330_v24 = vpop.f32.mrb[68].mxu1  ;;  %2582 = vmatprep.mubr.bf16.mxu0 %v2400_v25 }
 0x414   : > { %v2332_v62 = vpop.f32.mrb[69].mxu1  ;;  %2583 = vmatmul.mubr.bf16.vlgmr.msra.gmra.mrb[32].mxu0 %v2399_v4  ;;  %v2331_v27 = vadd.f32 %v2330_v24, %v4711_v60 }
 0x415   : > { %v2334_v29 = vpop.f32.mrb[70].mxu1  ;;  %v2333_v30 = vadd.f32 %v2332_v62, %v4713_v15 }
 0x416   : > { %v2335_v12 = vadd.f32 %v2334_v29, %v4711_v60  ;;  %v2336_v28 = vpop.f32.mrb[71].mxu1 }
 0x417   : > { %v2337_v21 = vadd.f32 %v2336_v28, %v4713_v15 }
 0x418   : > { %v2401_v31 = vpack.c.bf16 %v2335_v12, %v2331_v27 }
 0x419   : > { %v2402_v35 = vpack.c.bf16 %v2337_v21, %v2333_v30 }
 0x41b   : > { %v2340_v55 = vpop.f32.mrb[72].mxu1  ;;  %2590 = vmatprep.mubr.bf16.mxu0 %v2402_v35  ;;  %v3749_v35 = vld [vmem:[#allocation11 + $0x20] sm:$0xff]  }
 0x41c   : > { %v2342_v32 = vpop.f32.mrb[73].mxu1  ;;  %2591 = vmatmul.mubr.bf16.gmra.mrb[36].mxu0 %v2401_v31  ;;  %v2341_v34 = vadd.f32 %v2340_v55, %v4711_v60  ;;  %v3748_v31 = vld [vmem:[#allocation11 + $0x18] sm:$0xff]   ;;  %v3750_v55 = vld [vmem:[#allocation11 + $0x28] sm:$0xff]  }
 0x41d   : > { %v2344_v39 = vpop.f32.mrb[74].mxu1  ;;  %v2343_v63 = vadd.f32 %v2342_v32, %v4713_v15  ;;  %3395 = vmatprep.subr.bf16.mxu1 %v3748_v31  ;;  %v3751_v32 = vld [vmem:[#allocation11 + $0x30] sm:$0xff]  }
 0x41e   : > { %v2345_v33 = vadd.f32 %v2344_v39, %v4711_v60  ;;  %v2346_v8 = vpop.f32.mrb[75].mxu1  ;;  %3396 = vmatpush3.bf16.msra.mxu1 %v3748_v31  ;;  %v4750_v39 = vld [vmem:[%s4886_s23] ss:$0 sm:$0xff]  ;;  %s3963_s23 = sshll.u32 %s4049_s26, 4  ;;  %s3964_s23 = int_to_ptr.vmem [resolvable:$false] %s3963_s23 }
 0x41f   : > { %v2347_v26 = vadd.f32 %v2346_v8, %v4713_v15  ;;  %3397 = vmatprep.subr.bf16.mxu1 %v3749_v35  ;;  %s3965_s14 = scalar_lea.vmem %s3964_s23, 4096  ;;  %p3966_p12 = scmp.lt.s32.totalorder %s4794_s12, %s3964_s23 }
 0x420   : > { %v2403_v47 = vpack.c.bf16 %v2345_v33, %v2341_v34  ;;  %p3967_p2 = scmp.lt.s32.totalorder %s3965_s14, %s3959_s1 }
 0x421   : > { %v2404_v40 = vpack.c.bf16 %v2347_v26, %v2343_v63 }
 0x422   : > { %3398 = vmatpush3.bf16.msra.mxu1 %v3749_v35  ;;  %p3968_p1 = por %p3967_p2, %p3966_p12 }
 0x423   : > { %v2350_v42 = vpop.f32.mrb[76].mxu1  ;;  %2598 = vmatprep.mubr.bf16.mxu0 %v2404_v40  ;;  %3399 = vmatprep.subr.bf16.mxu1 %v3750_v55 }
 0x424   : > { %v2352_v51 = vpop.f32.mrb[77].mxu1  ;;  %2599 = vmatmul.mubr.bf16.gmra.mrb[40].mxu0 %v2403_v47  ;;  %v2351_v36 = vadd.f32 %v2350_v42, %v4711_v60  ;;  %p3969_p13 = pnand %p3968_p1, %p3962_p7 }
 0x425   : > { %v2354_v43 = vpop.f32.mrb[78].mxu1  ;;  %v2353_v46 = vadd.f32 %v2352_v51, %v4713_v15 }
 0x426   : > { %v2355_v5 = vadd.f32 %v2354_v43, %v4711_v60  ;;  %v2356_v45 = vpop.f32.mrb[79].mxu1  ;;  %3400 = vmatpush3.bf16.msra.mxu1 %v3750_v55 }
 0x427   : > { %v2357_v57 = vadd.f32 %v2356_v45, %v4713_v15  ;;  %3401 = vmatprep.subr.bf16.mxu1 %v3751_v32 }
 0x428   : > { %v2405_v48 = vpack.c.bf16 %v2355_v5, %v2351_v36 }
 0x429   : > { %v2406_v49 = vpack.c.bf16 %v2357_v57, %v2353_v46 }
 0x42a   : > { %3402 = vmatpush3.bf16.msra.mxu1 %v3751_v32 }
 0x42b   : > { %v2360_v61 = vpop.f32.mrb[80].mxu1  ;;  %2606 = vmatprep.mubr.bf16.mxu0 %v2406_v49 }
 0x42c   : > { %v2362_v7 = vpop.f32.mrb[81].mxu1  ;;  %2607 = vmatmul.mubr.bf16.gmra.mrb[44].mxu0 %v2405_v48  ;;  %v2361_v37 = vadd.f32 %v2360_v61, %v4711_v60 }
 0x42d   : > { %v2364_v9 = vpop.f32.mrb[82].mxu1  ;;  %v2363_v56 = vadd.f32 %v2362_v7, %v4713_v15 }
 0x42e   : > { %v2365_v44 = vadd.f32 %v2364_v9, %v4711_v60  ;;  %v2366_v52 = vpop.f32.mrb[83].mxu1 }
 0x42f   : > { %v2367_v53 = vadd.f32 %v2366_v52, %v4713_v15 }
 0x430   : > { %v2407_v58 = vpack.c.bf16 %v2365_v44, %v2361_v37 }
 0x431   : > { %v2408_v6 = vpack.c.bf16 %v2367_v53, %v2363_v56 }
 0x433   : > { %v2370_v2 = vpop.f32.mrb[84].mxu1  ;;  %2614 = vmatprep.mubr.bf16.mxu0 %v2408_v6 }
 0x434   : > { %v2372_v59 = vpop.f32.mrb[85].mxu1  ;;  %2615 = vmatmul.mubr.bf16.gmra.mrb[48].mxu0 %v2407_v58  ;;  %v2371_v1 = vadd.f32 %v2370_v2, %v4711_v60 }
 0x435   : > { %v2374_v18 = vpop.f32.mrb[86].mxu1  ;;  %v2373_v10 = vadd.f32 %v2372_v59, %v4713_v15 }
 0x436   : > { %v2375_v17 = vadd.f32 %v2374_v18, %v4711_v60  ;;  %v2376_v50 = vpop.f32.mrb[87].mxu1 }
 0x437   : > { %v2377_v22 = vadd.f32 %v2376_v50, %v4713_v15 }
 0x438   : > { %v2409_v0 = vpack.c.bf16 %v2375_v17, %v2371_v1 }
 0x439   : > { %v2410_v38 = vpack.c.bf16 %v2377_v22, %v2373_v10 }
 0x43b   : > { %v2380_v11 = vpop.f32.mrb[88].mxu1  ;;  %2622 = vmatprep.mubr.bf16.mxu0 %v2410_v38 }
 0x43c   : > { %v2382_v16 = vpop.f32.mrb[89].mxu1  ;;  %2623 = vmatmul.mubr.bf16.gmra.mrb[52].mxu0 %v2409_v0  ;;  %v2381_v14 = vadd.f32 %v2380_v11, %v4711_v60 }
 0x43d   : > { %v2384_v13 = vpop.f32.mrb[90].mxu1  ;;  %v2383_v54 = vadd.f32 %v2382_v16, %v4713_v15 }
 0x43e   : > { %v2385_v3 = vadd.f32 %v2384_v13, %v4711_v60  ;;  %v2386_v19 = vpop.f32.mrb[91].mxu1 }
 0x43f   : > { %v2387_v41 = vadd.f32 %v2386_v19, %v4713_v15 }
 0x440   : > { %v2411_v20 = vpack.c.bf16 %v2385_v3, %v2381_v14 }
 0x441   : > { %v2412_v23 = vpack.c.bf16 %v2387_v41, %v2383_v54 }
 0x443   : > { %v2390_v4 = vpop.f32.mrb[92].mxu1  ;;  %2630 = vmatprep.mubr.bf16.mxu0 %v2412_v23 }
 0x444   : > { %v2392_v25 = vpop.f32.mrb[93].mxu1  ;;  %2631 = vmatmul.mubr.bf16.gmra.mrb[56].mxu0 %v2411_v20  ;;  %v2391_v62 = vadd.f32 %v2390_v4, %v4711_v60 }
 0x445   : > { %v2394_v24 = vpop.f32.mrb[94].mxu1  ;;  %v2393_v12 = vadd.f32 %v2392_v25, %v4713_v15 }
 0x446   : > { %v2395_v29 = vadd.f32 %v2394_v24, %v4711_v60  ;;  %v2396_v27 = vpop.f32.mrb[95].mxu1  ;;  %v3752_v60 = vld [vmem:[#allocation11 + $0x38] sm:$0xff]  }
 0x447   : > { %v2397_v28 = vadd.f32 %v2396_v27, %v4713_v15  ;;  %3403 = vmatprep.subr.bf16.mxu1 %v3752_v60 }
 0x448   : > { %v2413_v30 = vpack.c.bf16 %v2395_v29, %v2391_v62  ;;  %3404 = vmatpush3.bf16.msra.mxu1 %v3752_v60 }
 0x449   : > { %v2414_v21 = vpack.c.bf16 %v2397_v28, %v2393_v12 }
 0x44b   : > { %2638 = vmatprep.mubr.bf16.mxu0 %v2414_v21 }
 0x44c   : > { %2639 = vmatmul.mubr.bf16.gmra.mrb[60].mxu0 %v2413_v30 }
 0x4e7   : > { %v3325_v15 = vpop.f32.mrb[32].mxu0 }
 0x4e8   : > { %v3326_v34 = vpop.f32.mrb[33].mxu0 }
 0x4e9   : > { %v3327_v33 = vadd.f32 %v3326_v34, %v3325_v15  ;;  %v3328_v8 = vpop.f32.mrb[34].mxu0 }
 0x4ea   : > { %v3329_v63 = vpop.f32.mrb[35].mxu0 }
 0x4eb   : > { %v2585_v26 = vadd.f32 %v3327_v33, %v4750_v39  ;;  %v3330_v47 = vadd.f32 %v3329_v63, %v3328_v8 }
 0x4ed   : > { %v2588_v40 = vadd.f32 %v3330_v47, %v4750_v39  ;;  %v2647_v42 = vmax.f32 %v2585_v26, 0.0 }
 0x4ef   : > { %v2648_v51 = vmax.f32 %v2588_v40, 0.0  ;;  %v3331_v43 = vpop.f32.mrb[36].mxu0 }
 0x4f0   : > { %v3332_v36 = vpop.f32.mrb[37].mxu0 }
 0x4f1   : > { %v3333_v5 = vadd.f32 %v3332_v36, %v3331_v43  ;;  %v3334_v45 = vpop.f32.mrb[38].mxu0  ;;  %v2663_v46 = vpack.c.bf16 %v2648_v51, %v2647_v42 }
 0x4f2   : > { %v3335_v57 = vpop.f32.mrb[39].mxu0 }
 0x4f3   : > { %v2593_v48 = vadd.f32 %v3333_v5, %v4750_v39  ;;  %v3336_v49 = vadd.f32 %v3335_v57, %v3334_v45  ;;  %3405 = vmatprep.mubr.bf16.mxu1 %v2663_v46 }
 0x4f5   : > { %v2596_v61 = vadd.f32 %v3336_v49, %v4750_v39  ;;  %v2649_v7 = vmax.f32 %v2593_v48, 0.0 }
 0x4f7   : > { %v2650_v9 = vmax.f32 %v2596_v61, 0.0  ;;  %v3337_v37 = vpop.f32.mrb[40].mxu0 }
 0x4f8   : > { %v3338_v44 = vpop.f32.mrb[41].mxu0 }
 0x4f9   : > { %v2664_v52 = vpack.c.bf16 %v2650_v9, %v2649_v7  ;;  %v3339_v56 = vadd.f32 %v3338_v44, %v3337_v37  ;;  %v3340_v53 = vpop.f32.mrb[42].mxu0 }
 0x4fa   : > { %v3341_v58 = vpop.f32.mrb[43].mxu0 }
 0x4fb   : > { %v2601_v6 = vadd.f32 %v3339_v56, %v4750_v39  ;;  %v3342_v2 = vadd.f32 %v3341_v58, %v3340_v53  ;;  %3406 = vmatmul.mubr.bf16.vlgmr.msra.gmra.mrb[96].mxu1 %v2664_v52  ;;  %v3164_v53 = vld [vmem:[%s4887_s22] ss:$0 sm:$0xff] }
 0x4fd   : > { %v2604_v59 = vadd.f32 %v3342_v2, %v4750_v39  ;;  %v2651_v18 = vmax.f32 %v2601_v6, 0.0 }
 0x4ff   : > { %v2652_v1 = vmax.f32 %v2604_v59, 0.0  ;;  %v3343_v17 = vpop.f32.mrb[44].mxu0 }
 0x500   : > { %v3344_v50 = vpop.f32.mrb[45].mxu0 }
 0x501   : > { %v3345_v10 = vadd.f32 %v3344_v50, %v3343_v17  ;;  %v3346_v22 = vpop.f32.mrb[46].mxu0  ;;  %v2665_v0 = vpack.c.bf16 %v2652_v1, %v2651_v18 }
 0x502   : > { %v3347_v38 = vpop.f32.mrb[47].mxu0 }
 0x503   : > { %v2609_v11 = vadd.f32 %v3345_v10, %v4750_v39  ;;  %v3348_v16 = vadd.f32 %v3347_v38, %v3346_v22  ;;  %3409 = vmatprep.mubr.bf16.mxu1 %v2665_v0 }
 0x505   : > { %v2612_v13 = vadd.f32 %v3348_v16, %v4750_v39  ;;  %v2653_v14 = vmax.f32 %v2609_v11, 0.0 }
 0x507   : > { %v2654_v3 = vmax.f32 %v2612_v13, 0.0  ;;  %v3349_v19 = vpop.f32.mrb[48].mxu0 }
 0x508   : > { %v3350_v54 = vpop.f32.mrb[49].mxu0 }
 0x509   : > { %v3351_v41 = vadd.f32 %v3350_v54, %v3349_v19  ;;  %v3352_v20 = vpop.f32.mrb[50].mxu0  ;;  %v2666_v23 = vpack.c.bf16 %v2654_v3, %v2653_v14 }
 0x50a   : > { %v3353_v4 = vpop.f32.mrb[51].mxu0 }
 0x50b   : > { %v2617_v25 = vadd.f32 %v3351_v41, %v4750_v39  ;;  %v3354_v24 = vadd.f32 %v3353_v4, %v3352_v20  ;;  %3410 = vmatmul.mubr.bf16.gmra.mrb[100].mxu1 %v2666_v23 }
 0x50d   : > { %v2620_v62 = vadd.f32 %v3354_v24, %v4750_v39  ;;  %v2655_v29 = vmax.f32 %v2617_v25, 0.0 }
 0x50f   : > { %v2656_v27 = vmax.f32 %v2620_v62, 0.0  ;;  %v3355_v12 = vpop.f32.mrb[52].mxu0 }
 0x510   : > { %v3356_v28 = vpop.f32.mrb[53].mxu0 }
 0x511   : > { %v3357_v30 = vadd.f32 %v3356_v28, %v3355_v12  ;;  %v3358_v21 = vpop.f32.mrb[54].mxu0  ;;  %v2667_v31 = vpack.c.bf16 %v2656_v27, %v2655_v29 }
 0x512   : > { %v3359_v35 = vpop.f32.mrb[55].mxu0 }
 0x513   : > { %v2625_v55 = vadd.f32 %v3357_v30, %v4750_v39  ;;  %v3360_v32 = vadd.f32 %v3359_v35, %v3358_v21  ;;  %3413 = vmatprep.mubr.bf16.mxu1 %v2667_v31 }
 0x515   : > { %v2628_v60 = vadd.f32 %v3360_v32, %v4750_v39  ;;  %v2657_v15 = vmax.f32 %v2625_v55, 0.0 }
 0x517   : > { %v2658_v34 = vmax.f32 %v2628_v60, 0.0  ;;  %v3361_v33 = vpop.f32.mrb[56].mxu0 }
 0x518   : > { %v3362_v8 = vpop.f32.mrb[57].mxu0 }
 0x519   : > { %v3363_v63 = vadd.f32 %v3362_v8, %v3361_v33  ;;  %v3364_v26 = vpop.f32.mrb[58].mxu0  ;;  %v2668_v47 = vpack.c.bf16 %v2658_v34, %v2657_v15 }
 0x51a   : > { %v3365_v40 = vpop.f32.mrb[59].mxu0 }
 0x51b   : > { %v2633_v42 = vadd.f32 %v3363_v63, %v4750_v39  ;;  %v3366_v51 = vadd.f32 %v3365_v40, %v3364_v26  ;;  %3414 = vmatmul.mubr.bf16.gmra.mrb[104].mxu1 %v2668_v47 }
 0x51d   : > { %v2636_v43 = vadd.f32 %v3366_v51, %v4750_v39  ;;  %v2659_v36 = vmax.f32 %v2633_v42, 0.0 }
 0x51f   : > { %v2660_v5 = vmax.f32 %v2636_v43, 0.0  ;;  %v3367_v45 = vpop.f32.mrb[60].mxu0 }
 0x520   : > { %v3368_v46 = vpop.f32.mrb[61].mxu0 }
 0x521   : > { %v3369_v57 = vadd.f32 %v3368_v46, %v3367_v45  ;;  %v3370_v48 = vpop.f32.mrb[62].mxu0  ;;  %v2669_v49 = vpack.c.bf16 %v2660_v5, %v2659_v36 }
 0x522   : > { %v3371_v61 = vpop.f32.mrb[63].mxu0 }
 0x523   : > { %v2641_v7 = vadd.f32 %v3369_v57, %v4750_v39  ;;  %v3372_v9 = vadd.f32 %v3371_v61, %v3370_v48  ;;  %3417 = vmatprep.mubr.bf16.mxu1 %v2669_v49 }
 0x525   : > { %v2644_v37 = vadd.f32 %v3372_v9, %v4750_v39  ;;  %v2661_v44 = vmax.f32 %v2641_v7, 0.0 }
 0x527   : > { %v2662_v52 = vmax.f32 %v2644_v37, 0.0 }
 0x529   : > { %v2670_v56 = vpack.c.bf16 %v2662_v52, %v2661_v44 }
 0x52b   : > { %3418 = vmatmul.mubr.bf16.gmra.mrb[108].mxu1 %v2670_v56 }
 0x5ce   : > { %v3407_v58 = vpop.f32.mrb[96].mxu1 }
 0x5cf   : > { %v2785_v6 = vadd.f32 %v3407_v58, %v3164_v53  ;;  %v2776_v2 = vpop.f32.mrb[97].mxu1 }
 0x5d0   : > { %v2777_v59 = vadd.f32 %v3164_v53, %v2776_v2  ;;  %v3408_v18 = vpop.f32.mrb[98].mxu1 }
 0x5d1   : > { %2841 = vst [vmem:[%s4772_s13 + $0x10] sm:$0xff] %v2785_v6  ;;  %v2788_v39 = vadd.f32 %v3408_v18, %v3164_v53  ;;  %v2779_v1 = vpop.f32.mrb[99].mxu1 }
 0x5d2   : > { %2839 = vst [vmem:[%s4772_s13] sm:$0xff] %v2777_v59  ;;  %v2780_v17 = vadd.f32 %v3164_v53, %v2779_v1 }
 0x5d3   : > { %2842 = vst [vmem:[%s4772_s13 + $0x18] sm:$0xff] %v2788_v39 }
 0x5d4   : > { %2840 = vst [vmem:[%s4772_s13 + $0x8] sm:$0xff] %v2780_v17 }
 0x5de   : > { %v3411_v50 = vpop.f32.mrb[100].mxu1 }
 0x5df   : > { %v2801_v10 = vadd.f32 %v3411_v50, %v3164_v53  ;;  %v2792_v22 = vpop.f32.mrb[101].mxu1 }
 0x5e0   : > { %v2793_v0 = vadd.f32 %v3164_v53, %v2792_v22  ;;  %v3412_v38 = vpop.f32.mrb[102].mxu1 }
 0x5e1   : > { %2845 = vst [vmem:[%s4772_s13 + $0x30] sm:$0xff] %v2801_v10  ;;  %v2804_v11 = vadd.f32 %v3412_v38, %v3164_v53  ;;  %v2795_v16 = vpop.f32.mrb[103].mxu1 }
 0x5e2   : > { %2843 = vst [vmem:[%s4772_s13 + $0x20] sm:$0xff] %v2793_v0  ;;  %v2796_v13 = vadd.f32 %v3164_v53, %v2795_v16 }
 0x5e3   : > { %2846 = vst [vmem:[%s4772_s13 + $0x38] sm:$0xff] %v2804_v11 }
 0x5e4   : > { %2844 = vst [vmem:[%s4772_s13 + $0x28] sm:$0xff] %v2796_v13 }
 0x5ee   : > { %v3415_v14 = vpop.f32.mrb[104].mxu1 }
 0x5ef   : > { %v2817_v3 = vadd.f32 %v3415_v14, %v3164_v53  ;;  %v2808_v19 = vpop.f32.mrb[105].mxu1 }
 0x5f0   : > { %v2809_v54 = vadd.f32 %v3164_v53, %v2808_v19  ;;  %v3416_v41 = vpop.f32.mrb[106].mxu1 }
 0x5f1   : > { %2849 = vst [vmem:[%s4772_s13 + $0x50] sm:$0xff] %v2817_v3  ;;  %v2820_v20 = vadd.f32 %v3416_v41, %v3164_v53  ;;  %v2811_v23 = vpop.f32.mrb[107].mxu1 }
 0x5f2   : > { %2847 = vst [vmem:[%s4772_s13 + $0x40] sm:$0xff] %v2809_v54  ;;  %v2812_v4 = vadd.f32 %v3164_v53, %v2811_v23 }
 0x5f3   : > { %2850 = vst [vmem:[%s4772_s13 + $0x58] sm:$0xff] %v2820_v20 }
 0x5f4   : > { %2848 = vst [vmem:[%s4772_s13 + $0x48] sm:$0xff] %v2812_v4 }
 0x5fe   : > { %v3419_v25 = vpop.f32.mrb[108].mxu1 }
 0x5ff   : > { %v2833_v24 = vadd.f32 %v3419_v25, %v3164_v53  ;;  %v2824_v62 = vpop.f32.mrb[109].mxu1 }
 0x600   : > { %v2825_v29 = vadd.f32 %v3164_v53, %v2824_v62  ;;  %v3420_v27 = vpop.f32.mrb[110].mxu1 }
 0x601   : > { %2853 = vst [vmem:[%s4772_s13 + $0x70] sm:$0xff] %v2833_v24  ;;  %v2836_v12 = vadd.f32 %v3420_v27, %v3164_v53  ;;  %v2827_v28 = vpop.f32.mrb[111].mxu1 }
 0x602   : > { %2851 = vst [vmem:[%s4772_s13 + $0x60] sm:$0xff] %v2825_v29  ;;  %v2828_v30 = vadd.f32 %v3164_v53, %v2827_v28 }
 0x603   : > { %2854 = vst [vmem:[%s4772_s13 + $0x78] sm:$0xff] %v2836_v12 }
 0x604   : > { %2852 = vst [vmem:[%s4772_s13 + $0x68] sm:$0xff] %v2828_v30 }
 0x605   : > { %3972 = shalt.err (!%p3969_p13)
}
 0x606   : > { %s3973_s15 = scalar_lea.hbm %s4792_s10, 2048  ;;  %s3977_s13 = scalar_lea.hbm %s4888_s20, 4096 }
 0x607   : > { %p3974_p9 = scmp.ne.s32.totalorder %s4792_s10, %s3973_s15  ;;  %p3978_p4 = scmp.lt.u32.totalorder %s4792_s10, %s4888_s20 }
 0x608   : > { %p3979_p8 = scmp.lt.u32.totalorder %s3977_s13, %s3973_s15  ;;  %p3981_p3 = scmp.lt.u32.totalorder %s3973_s15, %s4792_s10 }
 0x609   : > { %p3975_p0 = pnand %p3974_p9, %p4287_p10 }
 0x60a   : > { %p3980_p6 = por %p3979_p8, %p3978_p4 }
 0x60b   : > { %p3976_p11 = pneg %p3975_p0 }
 0x60c   : > { %p3982_p5 = por %p3981_p3, %p3980_p6 }
 0x60e   : > { %p3983_p7 = pnand %p3982_p5, %p3976_p11 }
 0x610   : > { %3986 = shalt.err (!%p3983_p7)
}
 0x611   : > { %s4050_s16 = smov 128   ;;  %s4051_s1 = smov 8  }
 0x612   : > { %3471 = dma.vmem_to_hbm [thread:$0]  (%p4287_p10), %s4794_s12, 2048, %s4792_s10, %s2856_s4, %s4050_s16, %s4050_s16, %s4051_s1  }
 0x613 PF: > { %s4889_s26 = sld [smem:[#allocation17_spill]]  ;;  %s4890_s23 = sld [smem:[#allocation18_spill]] }
 0x614   : > { %p4892_p2 = scmp.ge.s32.totalorder %s4033_s30, 2 }
 0x619   : > { %s2884_s14 = sand.u32 1, %s4889_s26   ;;  %p4891_p12 = scmp.ne.s32.totalorder %s4890_s23, 0 }
 0x61a   : > { %s2885_s15 = scalar_lea.sflag [#allocation5], %s2884_s14 }
 0x61b   : > { %p3491_p1 = pnand %p4892_p2, %p4891_p12 }
 0x61d   : > { %4016 = dma.done.wait (!%p3491_p1), %s2885_s15, 2048  }
 0x61e   : > { %4018 = vsyncadd (!%p3491_p1), %s2885_s15, 4294965248  ;;  %p30_p13 = scmp.ge.s32.totalorder %s4277_s18, 4   ;;  %s4893_s27 = smov %s4025_s28 }
 0x61f   : > { %s4894_s28 = smov %s4029_s29  ;;  %s4895_s29 = smov %s4293_s25 }
 0x620   : > { %s4896_s30 = smov %s4277_s18  ;;  %32 = sbr.rel (!%p30_p13) target bundleno = 12 (0xc), region = 133 }
 0x627   :  { %2890 = vsyncpa [#allocation4], 1 }
 0x628   :  { %2892 = vsyncpa [#allocation4 + $0x1], 1 }
 0x629   :  { %2893 = vsyncpa [#allocation7], 1 }
 0x62a   :  { %2894 = vsyncpa [#allocation10], 1 }
 0x62b   :  { %2895 = vsyncpa [#allocation5], 1 }
 0x62c   :  { %2897 = vsyncpa [#allocation5 + $0x1], 1 }

</bundles_post_ra>
